<compile_context>
chip_gen: v5e
topology: v5e:2x2
jax: 0.10.0
libtpu: 0.0.40
codegen_flags: <defaults>
</compile_context>

<pallas_src>
import numpy as np
import jax
import jax.numpy as jnp
from jax import lax
from jax.experimental import pallas as pl
from jax.experimental.pallas import tpu as pltpu

CONV_CH = 20                 # real conv output channels
POOL = 12                    # pooled spatial size (12 x 12)
COLS_HALF = 256              # lane-aligned (pw, o) block: 12*20 = 240 real + 16 pad
CONV_COLS = 2 * COLS_HALF    # 512 columns: (qx, pw, o)
OUT_ROWS = 24                # un-pooled conv output rows (y)
IMG_PAD = 32                 # 28 + 2 + 2
KTAPS = 9                    # composed 9x9 kernel
NUM_CLASSES = 10
CLS_PAD = 128                # lane-dense logits
NEG_BIG = -1e30


# ----------------------------------------------------------------------------
# Gabor filter bank (deterministic; closed-form replica of cv2.getGaborKernel,
# including cv2's (ymax-y, xmax-x) index flip).
# ----------------------------------------------------------------------------
def generate_gabor_filters(size=5, num_filters=16, sigma=3.0, lambd=10.0,
                           gamma=0.5, psi=0.0):
    half = size // 2
    ys, xs = np.mgrid[-half:half + 1, -half:half + 1].astype(np.float64)
    filters = []
    for i in range(num_filters):
        theta = np.pi * i / num_filters
        c, s = np.cos(theta), np.sin(theta)
        xr = xs * c + ys * s
        yr = -xs * s + ys * c
        k = (np.exp(-0.5 * (xr ** 2 / sigma ** 2 + yr ** 2 / (sigma / gamma) ** 2))
             * np.cos(2.0 * np.pi * xr / lambd + psi))
        filters.append(k[::-1, ::-1].astype(np.float32))
    return np.stack(filters)[:, None, :, :]                # (16, 1, 5, 5)


# ----------------------------------------------------------------------------
# Host-side parameter preparation (done ONCE, outside the forward pass).
# ----------------------------------------------------------------------------
def prepare_params(params):
    gabor = np.asarray(params["gabor"], np.float32)        # (16, 1, 5, 5)
    w2c = np.asarray(params["conv2_w"], np.float32)        # (20, 16, 5, 5)
    b2c = np.asarray(params["conv2_b"], np.float32)        # (20,)
    fc1_w = np.asarray(params["fc1_w"], np.float32)        # (nf, 2880)
    fc1_b = np.asarray(params["fc1_b"], np.float32)        # (nf,)
    fc2_w = np.asarray(params["fc2_w"], np.float32)        # (10, nf)
    fc2_b = np.asarray(params["fc2_b"], np.float32)        # (10,)
    nf = fc1_w.shape[0]
    assert fc1_w.shape[1] == CONV_CH * POOL * POOL

    # conv1 o conv2 -> one 9x9 kernel (exact: both convs are linear, no act
    # between).  w9[o, p+a, q+b] += sum_c w2[o,c,p,q] * gabor[c,0,a,b]
    w9 = np.zeros((CONV_CH, 9, 9), np.float32)
    for p in range(5):
        for q in range(5):
            w9[:, p:p + 5, q:q + 5] += np.einsum(
                "oc,cab->oab", w2c[:, :, p, q], gabor[:, 0])

    # Banded conv weights for 9 row-shifted matmuls (in-kernel im2col):
    #   out2d[y, qx*256 + pw*20 + o] = sum_dy xpad[y+dy, :] @ wb[dy]
    # i.e. wb[dy, x+dx, qx*256 + pw*20 + o] = w9[o, dy, dx] with x = 2*pw + qx.
    wb = np.zeros((KTAPS, IMG_PAD, CONV_COLS), np.float32)
    for dy in range(KTAPS):
        for qx in range(2):
            for pw in range(POOL):
                x0 = 2 * pw + qx
                c0 = qx * COLS_HALF + pw * CONV_CH
                wb[dy, x0:x0 + 9, c0:c0 + CONV_CH] = w9[:, dy, :].T   # (9, 20)

    # conv bias per pooled column (pw, o); padded columns stay 0.
    bc = np.zeros((1, COLS_HALF), np.float32)
    bc[0, :POOL * CONV_CH] = np.tile(b2c, POOL)

    # fc1 repacked to the pooled layout (ph, pw*20+o, f).  torch flatten order
    # is (o, ph, pw); padded columns (240:256) get zero rows.  No hidden pad.
    t = fc1_w.reshape(nf, CONV_CH, POOL, POOL).transpose(2, 3, 1, 0)  # (ph,pw,o,f)
    w1 = np.zeros((POOL, COLS_HALF, nf), np.float32)
    w1[:, :POOL * CONV_CH, :] = t.reshape(POOL, POOL * CONV_CH, nf)
    b1 = fc1_b.reshape(1, nf)

    # fc2 padded to 128 logit lanes; padded columns get a huge negative bias so
    # the in-kernel log_softmax over 128 lanes is exact for the real 10 classes.
    w2 = np.zeros((nf, CLS_PAD), np.float32)
    w2[:, :NUM_CLASSES] = fc2_w.T
    b2 = np.full((1, CLS_PAD), NEG_BIG, np.float32)
    b2[0, :NUM_CLASSES] = fc2_b

    return {
        "wb": jnp.asarray(wb, jnp.bfloat16),   # bf16 weights, f32 accumulation
        "bc": jnp.asarray(bc),
        "w1": jnp.asarray(w1, jnp.bfloat16),
        "b1": jnp.asarray(b1),
        "w2": jnp.asarray(w2, jnp.bfloat16),
        "b2": jnp.asarray(b2),
    }


# ----------------------------------------------------------------------------
# Fused kernel: conv(9x9, composed) + 2x2 max-pool + ReLU + fc1 + ReLU + fc2
# + log_softmax, one image per grid step.
# ----------------------------------------------------------------------------
def _gabor_fused_kernel(x_ref, wb_ref, bc_ref, w1_ref, b1_ref, w2_ref, b2_ref,
                        o_ref):
    xp = x_ref[0]                                            # (32, 32) f32

    # Composed conv as 9 row-shifted banded matmuls (in-kernel im2col).
    acc = jnp.dot(xp[0:OUT_ROWS, :].astype(jnp.bfloat16), wb_ref[0],
                  preferred_element_type=jnp.float32)        # (24, 512)
    for dy in range(1, KTAPS):
        acc = acc + jnp.dot(xp[dy:dy + OUT_ROWS, :].astype(jnp.bfloat16),
                            wb_ref[dy], preferred_element_type=jnp.float32)
    # acc[y, qx*256 + pw*20 + o] = conv (no bias) at channel o, row y, col 2*pw+qx

    # 2x2 max pool: qx halves are contiguous 256-lane blocks; qy (row pairs)
    # via two tiny 0/1 row-selection matmuls (exact, avoids strided slices).
    m1 = jnp.maximum(acc[:, :COLS_HALF], acc[:, COLS_HALF:])          # (24, 256)
    ph = lax.broadcasted_iota(jnp.int32, (POOL, OUT_ROWS), 0)
    yy = lax.broadcasted_iota(jnp.int32, (POOL, OUT_ROWS), 1)
    sel_e = (yy == 2 * ph).astype(jnp.float32)               # picks rows 0,2,...
    sel_o = (yy == 2 * ph + 1).astype(jnp.float32)           # picks rows 1,3,...
    pooled = jnp.maximum(
        jnp.dot(sel_e, m1, preferred_element_type=jnp.float32),
        jnp.dot(sel_o, m1, preferred_element_type=jnp.float32))       # (12, 256)

    # Conv bias folded after pooling (max(a+b, c+b) == max(a, c) + b), then ReLU.
    pooled = jnp.maximum(pooled + bc_ref[...], 0.0)

    # fc1: h[f] = sum_{ph, col} pooled[ph, col] * w1[ph, col, f] (no flatten).
    h = b1_ref[...]                                          # (1, nf) f32
    for p in range(POOL):
        h = h + jnp.dot(pooled[p:p + 1, :].astype(jnp.bfloat16), w1_ref[p],
                        preferred_element_type=jnp.float32)
    h = jnp.maximum(h, 0.0).astype(jnp.bfloat16)             # (1, nf)

    # fc2 + log_softmax (padded logit columns carry -1e30 bias -> exp == 0).
    z = jnp.dot(h, w2_ref[...],
                preferred_element_type=jnp.float32) + b2_ref[...]      # (1, 128)
    m = jnp.max(z, axis=-1, keepdims=True)
    s = z - m
    lse = jnp.log(jnp.sum(jnp.exp(s), axis=-1, keepdims=True))
    o_ref[0] = s - lse


def gabor_fused(xpad, wb, bc, w1, b1, w2, b2):
    N = xpad.shape[0]
    nf = w1.shape[-1]
    # TODO(synk): for N >= 8, block several images per grid step (block (Bb,32,32),
    # flatten Bb into the conv matmul M dim) to amortize the ~0.35us/step cost.
    return pl.pallas_call(
        _gabor_fused_kernel,
        out_shape=jax.ShapeDtypeStruct((N, 1, CLS_PAD), jnp.float32),
        grid_spec=pltpu.PrefetchScalarGridSpec(
            num_scalar_prefetch=0,
            grid=(N,),
            in_specs=[
                pl.BlockSpec((1, IMG_PAD, IMG_PAD), lambda n: (n, 0, 0)),
                # constant-index weight blocks -> DMA'd once, resident in VMEM
                pl.BlockSpec((KTAPS, IMG_PAD, CONV_COLS), lambda n: (0, 0, 0)),
                pl.BlockSpec((1, COLS_HALF), lambda n: (0, 0)),
                pl.BlockSpec((POOL, COLS_HALF, nf), lambda n: (0, 0, 0)),
                pl.BlockSpec((1, nf), lambda n: (0, 0)),
                pl.BlockSpec((nf, CLS_PAD), lambda n: (0, 0)),
                pl.BlockSpec((1, CLS_PAD), lambda n: (0, 0)),
            ],
            out_specs=pl.BlockSpec((1, 1, CLS_PAD), lambda n: (n, 0, 0)),
        ),
        compiler_params=pltpu.CompilerParams(dimension_semantics=("parallel",)),
    )(xpad, wb, bc, w1, b1, w2, b2)


# ----------------------------------------------------------------------------
# Full forward pass (one pallas_call; only a 28->32 zero-pad and a final
# 10-class slice happen in XLA).
# ----------------------------------------------------------------------------
@jax.jit
def gabor_network_forward(x, prepped):
    xpad = jnp.pad(x[:, 0], ((0, 0), (2, 2), (2, 2)))        # (N, 32, 32) f32
    out = gabor_fused(xpad, prepped["wb"], prepped["bc"], prepped["w1"],
                      prepped["b1"], prepped["w2"], prepped["b2"])
    return out[:, 0, :NUM_CLASSES]


# Pure-JAX reference (semantic check vs. the original module, uses raw params).
def reference_forward(x, params):
    y1 = jax.lax.conv_general_dilated(
        x, params["gabor"], (1, 1), ((2, 2), (2, 2)),
        dimension_numbers=("NCHW", "OIHW", "NCHW"))
    y2 = jax.lax.conv_general_dilated(
        y1, params["conv2_w"], (1, 1), "VALID",
        dimension_numbers=("NCHW", "OIHW", "NCHW"))
    y2 = y2 + params["conv2_b"][None, :, None, None]
    N, C, H, W = y2.shape
    y3 = jnp.max(y2.reshape(N, C, H // 2, 2, W // 2, 2), axis=(3, 5))
    y3 = jnp.maximum(y3, 0.0).reshape(N, -1)
    y4 = jnp.maximum(y3 @ params["fc1_w"].T + params["fc1_b"], 0.0)
    z = y4 @ params["fc2_w"].T + params["fc2_b"]
    return jax.nn.log_softmax(z, axis=1)


if __name__ == "__main__":
    num_fc_nodes = 64
    batch = 2

    key = jax.random.PRNGKey(0)
    kx, k1, k2, k3, k4, k5, k6 = jax.random.split(key, 7)
    params = {
        "gabor": jnp.asarray(generate_gabor_filters(size=5, num_filters=16)),
        "conv2_w": jax.random.normal(k1, (20, 16, 5, 5), jnp.float32)
                   * (1.0 / np.sqrt(16 * 25)),
        "conv2_b": jax.random.normal(k2, (20,), jnp.float32) * 0.01,
        "fc1_w": jax.random.normal(k3, (num_fc_nodes, 20 * 12 * 12), jnp.float32)
                 * (1.0 / np.sqrt(20 * 12 * 12)),
        "fc1_b": jax.random.normal(k4, (num_fc_nodes,), jnp.float32) * 0.01,
        "fc2_w": jax.random.normal(k5, (10, num_fc_nodes), jnp.float32)
                 * (1.0 / np.sqrt(num_fc_nodes)),
        "fc2_b": jax.random.normal(k6, (10,), jnp.float32) * 0.01,
    }

    # One-time host-side preparation: conv composition + weight repack/bf16.
    prepped = prepare_params(params)

    # Input: MNIST-like NCHW (required by x.view(-1, 20*12*12)).
    x = jax.random.normal(kx, (batch, 1, 28, 28), jnp.float32)

    out = jax.block_until_ready(gabor_network_forward(x, prepped))

    assert out.shape == (batch, 10), out.shape
    assert out.dtype == jnp.float32
    out_np = np.asarray(out)
    assert np.all(np.isfinite(out_np))
    # log_softmax invariant: rows of exp(out) sum to 1
    assert np.allclose(np.exp(out_np).sum(axis=1), 1.0, atol=1e-4)
    # semantic check vs. pure-JAX f32 reference (bf16 weights -> small drift)
    ref = np.asarray(jax.block_until_ready(reference_forward(x, params)))
    assert np.allclose(out_np, ref, atol=5e-2, rtol=5e-2), \
        np.max(np.abs(out_np - ref))

    print("KERNEL_OK")
</pallas_src>

<mosaic_0001>
module attributes {stable_mosaic.version = 11 : i64} {
  func.func @_gabor_fused_kernel(%arg0: i32, %arg1: memref<1x32x32xf32, #tpu.memory_space<vmem>>, %arg2: memref<9x32x512xbf16, #tpu.memory_space<vmem>>, %arg3: memref<1x256xf32, #tpu.memory_space<vmem>>, %arg4: memref<12x256x64xbf16, #tpu.memory_space<vmem>>, %arg5: memref<1x64xf32, #tpu.memory_space<vmem>>, %arg6: memref<64x128xbf16, #tpu.memory_space<vmem>>, %arg7: memref<1x128xf32, #tpu.memory_space<vmem>>, %arg8: memref<1x1x128xf32, #tpu.memory_space<vmem>>) attributes {dimension_semantics = [#tpu.dimension_semantics<parallel>], iteration_bounds = array<i64: 2>, scalar_prefetch = 0 : i64, scratch_operands = 0 : i64, tpu.core_type = #tpu.core_type<tc>, window_params = [{transform_indices = @transform_0, window_bounds = array<i64: 1, 32, 32>}, {pipeline_mode = #tpu.pipeline_mode<synchronous>, transform_indices = @transform_1, window_bounds = array<i64: 9, 32, 512>}, {pipeline_mode = #tpu.pipeline_mode<synchronous>, transform_indices = @transform_2, window_bounds = array<i64: 1, 256>}, {pipeline_mode = #tpu.pipeline_mode<synchronous>, transform_indices = @transform_3, window_bounds = array<i64: 12, 256, 64>}, {pipeline_mode = #tpu.pipeline_mode<synchronous>, transform_indices = @transform_4, window_bounds = array<i64: 1, 64>}, {pipeline_mode = #tpu.pipeline_mode<synchronous>, transform_indices = @transform_5, window_bounds = array<i64: 64, 128>}, {pipeline_mode = #tpu.pipeline_mode<synchronous>, transform_indices = @transform_6, window_bounds = array<i64: 1, 128>}, {transform_indices = @transform_7, window_bounds = array<i64: 1, 1, 128>}]} {
    %c0 = arith.constant 0 : index
    %c0_0 = arith.constant 0 : index
    %c0_1 = arith.constant 0 : index
    %0 = vector.load %arg1[%c0, %c0_0, %c0_1] : memref<1x32x32xf32, #tpu.memory_space<vmem>>, vector<1x32x32xf32>
    %1 = vector.shape_cast %0 : vector<1x32x32xf32> to vector<32x32xf32>
    %2 = vector.extract_strided_slice %1 {offsets = [0, 0], sizes = [24, 32], strides = [1, 1]} : vector<32x32xf32> to vector<24x32xf32>
    %3 = arith.truncf %2 : vector<24x32xf32> to vector<24x32xbf16>
    %c0_2 = arith.constant 0 : index
    %c0_3 = arith.constant 0 : index
    %c0_4 = arith.constant 0 : index
    %4 = vector.load %arg2[%c0_2, %c0_3, %c0_4] : memref<9x32x512xbf16, #tpu.memory_space<vmem>>, vector<1x32x512xbf16>
    %5 = vector.shape_cast %4 : vector<1x32x512xbf16> to vector<32x512xbf16>
    %cst = arith.constant dense<0.000000e+00> : vector<24x512xf32>
    %6 = tpu.matmul %3, %5, %cst {dimension_numbers = #tpu.dot_dimension_numbers<[1], [0], [0], [1], [0, 0, 1, 1], [], []>} : vector<24x32xbf16>, vector<32x512xbf16>, vector<24x512xf32> -> vector<24x512xf32>
    %7 = vector.extract_strided_slice %1 {offsets = [1, 0], sizes = [24, 32], strides = [1, 1]} : vector<32x32xf32> to vector<24x32xf32>
    %8 = arith.truncf %7 : vector<24x32xf32> to vector<24x32xbf16>
    %c1 = arith.constant 1 : index
    %c0_5 = arith.constant 0 : index
    %c0_6 = arith.constant 0 : index
    %9 = vector.load %arg2[%c1, %c0_5, %c0_6] : memref<9x32x512xbf16, #tpu.memory_space<vmem>>, vector<1x32x512xbf16>
    %10 = vector.shape_cast %9 : vector<1x32x512xbf16> to vector<32x512xbf16>
    %cst_7 = arith.constant dense<0.000000e+00> : vector<24x512xf32>
    %11 = tpu.matmul %8, %10, %cst_7 {dimension_numbers = #tpu.dot_dimension_numbers<[1], [0], [0], [1], [0, 0, 1, 1], [], []>} : vector<24x32xbf16>, vector<32x512xbf16>, vector<24x512xf32> -> vector<24x512xf32>
    %12 = arith.addf %6, %11 : vector<24x512xf32>
    %13 = vector.extract_strided_slice %1 {offsets = [2, 0], sizes = [24, 32], strides = [1, 1]} : vector<32x32xf32> to vector<24x32xf32>
    %14 = arith.truncf %13 : vector<24x32xf32> to vector<24x32xbf16>
    %c2 = arith.constant 2 : index
    %c0_8 = arith.constant 0 : index
    %c0_9 = arith.constant 0 : index
    %15 = vector.load %arg2[%c2, %c0_8, %c0_9] : memref<9x32x512xbf16, #tpu.memory_space<vmem>>, vector<1x32x512xbf16>
    %16 = vector.shape_cast %15 : vector<1x32x512xbf16> to vector<32x512xbf16>
    %cst_10 = arith.constant dense<0.000000e+00> : vector<24x512xf32>
    %17 = tpu.matmul %14, %16, %cst_10 {dimension_numbers = #tpu.dot_dimension_numbers<[1], [0], [0], [1], [0, 0, 1, 1], [], []>} : vector<24x32xbf16>, vector<32x512xbf16>, vector<24x512xf32> -> vector<24x512xf32>
    %18 = arith.addf %12, %17 : vector<24x512xf32>
    %19 = vector.extract_strided_slice %1 {offsets = [3, 0], sizes = [24, 32], strides = [1, 1]} : vector<32x32xf32> to vector<24x32xf32>
    %20 = arith.truncf %19 : vector<24x32xf32> to vector<24x32xbf16>
    %c3 = arith.constant 3 : index
    %c0_11 = arith.constant 0 : index
    %c0_12 = arith.constant 0 : index
    %21 = vector.load %arg2[%c3, %c0_11, %c0_12] : memref<9x32x512xbf16, #tpu.memory_space<vmem>>, vector<1x32x512xbf16>
    %22 = vector.shape_cast %21 : vector<1x32x512xbf16> to vector<32x512xbf16>
    %cst_13 = arith.constant dense<0.000000e+00> : vector<24x512xf32>
    %23 = tpu.matmul %20, %22, %cst_13 {dimension_numbers = #tpu.dot_dimension_numbers<[1], [0], [0], [1], [0, 0, 1, 1], [], []>} : vector<24x32xbf16>, vector<32x512xbf16>, vector<24x512xf32> -> vector<24x512xf32>
    %24 = arith.addf %18, %23 : vector<24x512xf32>
    %25 = vector.extract_strided_slice %1 {offsets = [4, 0], sizes = [24, 32], strides = [1, 1]} : vector<32x32xf32> to vector<24x32xf32>
    %26 = arith.truncf %25 : vector<24x32xf32> to vector<24x32xbf16>
    %c4 = arith.constant 4 : index
    %c0_14 = arith.constant 0 : index
    %c0_15 = arith.constant 0 : index
    %27 = vector.load %arg2[%c4, %c0_14, %c0_15] : memref<9x32x512xbf16, #tpu.memory_space<vmem>>, vector<1x32x512xbf16>
    %28 = vector.shape_cast %27 : vector<1x32x512xbf16> to vector<32x512xbf16>
    %cst_16 = arith.constant dense<0.000000e+00> : vector<24x512xf32>
    %29 = tpu.matmul %26, %28, %cst_16 {dimension_numbers = #tpu.dot_dimension_numbers<[1], [0], [0], [1], [0, 0, 1, 1], [], []>} : vector<24x32xbf16>, vector<32x512xbf16>, vector<24x512xf32> -> vector<24x512xf32>
    %30 = arith.addf %24, %29 : vector<24x512xf32>
    %31 = vector.extract_strided_slice %1 {offsets = [5, 0], sizes = [24, 32], strides = [1, 1]} : vector<32x32xf32> to vector<24x32xf32>
    %32 = arith.truncf %31 : vector<24x32xf32> to vector<24x32xbf16>
    %c5 = arith.constant 5 : index
    %c0_17 = arith.constant 0 : index
    %c0_18 = arith.constant 0 : index
    %33 = vector.load %arg2[%c5, %c0_17, %c0_18] : memref<9x32x512xbf16, #tpu.memory_space<vmem>>, vector<1x32x512xbf16>
    %34 = vector.shape_cast %33 : vector<1x32x512xbf16> to vector<32x512xbf16>
    %cst_19 = arith.constant dense<0.000000e+00> : vector<24x512xf32>
    %35 = tpu.matmul %32, %34, %cst_19 {dimension_numbers = #tpu.dot_dimension_numbers<[1], [0], [0], [1], [0, 0, 1, 1], [], []>} : vector<24x32xbf16>, vector<32x512xbf16>, vector<24x512xf32> -> vector<24x512xf32>
    %36 = arith.addf %30, %35 : vector<24x512xf32>
    %37 = vector.extract_strided_slice %1 {offsets = [6, 0], sizes = [24, 32], strides = [1, 1]} : vector<32x32xf32> to vector<24x32xf32>
    %38 = arith.truncf %37 : vector<24x32xf32> to vector<24x32xbf16>
    %c6 = arith.constant 6 : index
    %c0_20 = arith.constant 0 : index
    %c0_21 = arith.constant 0 : index
    %39 = vector.load %arg2[%c6, %c0_20, %c0_21] : memref<9x32x512xbf16, #tpu.memory_space<vmem>>, vector<1x32x512xbf16>
    %40 = vector.shape_cast %39 : vector<1x32x512xbf16> to vector<32x512xbf16>
    %cst_22 = arith.constant dense<0.000000e+00> : vector<24x512xf32>
    %41 = tpu.matmul %38, %40, %cst_22 {dimension_numbers = #tpu.dot_dimension_numbers<[1], [0], [0], [1], [0, 0, 1, 1], [], []>} : vector<24x32xbf16>, vector<32x512xbf16>, vector<24x512xf32> -> vector<24x512xf32>
    %42 = arith.addf %36, %41 : vector<24x512xf32>
    %43 = vector.extract_strided_slice %1 {offsets = [7, 0], sizes = [24, 32], strides = [1, 1]} : vector<32x32xf32> to vector<24x32xf32>
    %44 = arith.truncf %43 : vector<24x32xf32> to vector<24x32xbf16>
    %c7 = arith.constant 7 : index
    %c0_23 = arith.constant 0 : index
    %c0_24 = arith.constant 0 : index
    %45 = vector.load %arg2[%c7, %c0_23, %c0_24] : memref<9x32x512xbf16, #tpu.memory_space<vmem>>, vector<1x32x512xbf16>
    %46 = vector.shape_cast %45 : vector<1x32x512xbf16> to vector<32x512xbf16>
    %cst_25 = arith.constant dense<0.000000e+00> : vector<24x512xf32>
    %47 = tpu.matmul %44, %46, %cst_25 {dimension_numbers = #tpu.dot_dimension_numbers<[1], [0], [0], [1], [0, 0, 1, 1], [], []>} : vector<24x32xbf16>, vector<32x512xbf16>, vector<24x512xf32> -> vector<24x512xf32>
    %48 = arith.addf %42, %47 : vector<24x512xf32>
    %49 = vector.extract_strided_slice %1 {offsets = [8, 0], sizes = [24, 32], strides = [1, 1]} : vector<32x32xf32> to vector<24x32xf32>
    %50 = arith.truncf %49 : vector<24x32xf32> to vector<24x32xbf16>
    %c8 = arith.constant 8 : index
    %c0_26 = arith.constant 0 : index
    %c0_27 = arith.constant 0 : index
    %51 = vector.load %arg2[%c8, %c0_26, %c0_27] : memref<9x32x512xbf16, #tpu.memory_space<vmem>>, vector<1x32x512xbf16>
    %52 = vector.shape_cast %51 : vector<1x32x512xbf16> to vector<32x512xbf16>
    %cst_28 = arith.constant dense<0.000000e+00> : vector<24x512xf32>
    %53 = tpu.matmul %50, %52, %cst_28 {dimension_numbers = #tpu.dot_dimension_numbers<[1], [0], [0], [1], [0, 0, 1, 1], [], []>} : vector<24x32xbf16>, vector<32x512xbf16>, vector<24x512xf32> -> vector<24x512xf32>
    %54 = arith.addf %48, %53 : vector<24x512xf32>
    %55 = vector.extract_strided_slice %54 {offsets = [0, 0], sizes = [24, 256], strides = [1, 1]} : vector<24x512xf32> to vector<24x256xf32>
    %56 = vector.extract_strided_slice %54 {offsets = [0, 256], sizes = [24, 256], strides = [1, 1]} : vector<24x512xf32> to vector<24x256xf32>
    %57 = arith.maximumf %55, %56 : vector<24x256xf32>
    %58 = tpu.iota {dimensions = array<i32: 0>} : vector<12x24xi32>
    %59 = tpu.iota {dimensions = array<i32: 1>} : vector<12x24xi32>
    %c2_i32 = arith.constant 2 : i32
    %60 = vector.broadcast %c2_i32 : i32 to vector<12x24xi32>
    %61 = arith.muli %60, %58 : vector<12x24xi32>
    %62 = arith.cmpi eq, %59, %61 : vector<12x24xi32>
    %63 = arith.extui %62 : vector<12x24xi1> to vector<12x24xi32>
    %64 = arith.sitofp %63 : vector<12x24xi32> to vector<12x24xf32>
    %c2_i32_29 = arith.constant 2 : i32
    %65 = vector.broadcast %c2_i32_29 : i32 to vector<12x24xi32>
    %66 = arith.muli %65, %58 : vector<12x24xi32>
    %c1_i32 = arith.constant 1 : i32
    %67 = vector.broadcast %c1_i32 : i32 to vector<12x24xi32>
    %68 = arith.addi %66, %67 : vector<12x24xi32>
    %69 = arith.cmpi eq, %59, %68 : vector<12x24xi32>
    %70 = arith.extui %69 : vector<12x24xi1> to vector<12x24xi32>
    %71 = arith.sitofp %70 : vector<12x24xi32> to vector<12x24xf32>
    %cst_30 = arith.constant dense<0.000000e+00> : vector<12x256xf32>
    %72 = tpu.matmul %64, %57, %cst_30 {dimension_numbers = #tpu.dot_dimension_numbers<[1], [0], [0], [1], [0, 0, 1, 1], [], []>} : vector<12x24xf32>, vector<24x256xf32>, vector<12x256xf32> -> vector<12x256xf32>
    %cst_31 = arith.constant dense<0.000000e+00> : vector<12x256xf32>
    %73 = tpu.matmul %71, %57, %cst_31 {dimension_numbers = #tpu.dot_dimension_numbers<[1], [0], [0], [1], [0, 0, 1, 1], [], []>} : vector<12x24xf32>, vector<24x256xf32>, vector<12x256xf32> -> vector<12x256xf32>
    %74 = arith.maximumf %72, %73 : vector<12x256xf32>
    %c0_32 = arith.constant 0 : index
    %c0_33 = arith.constant 0 : index
    %75 = vector.load %arg3[%c0_32, %c0_33] : memref<1x256xf32, #tpu.memory_space<vmem>>, vector<1x256xf32>
    %76 = vector.broadcast %75 : vector<1x256xf32> to vector<12x256xf32>
    %77 = arith.addf %74, %76 : vector<12x256xf32>
    %cst_34 = arith.constant 0.000000e+00 : f32
    %78 = vector.broadcast %cst_34 : f32 to vector<12x256xf32>
    %79 = arith.maximumf %77, %78 : vector<12x256xf32>
    %c0_35 = arith.constant 0 : index
    %c0_36 = arith.constant 0 : index
    %80 = vector.load %arg5[%c0_35, %c0_36] : memref<1x64xf32, #tpu.memory_space<vmem>>, vector<1x64xf32>
    %81 = vector.extract_strided_slice %79 {offsets = [0, 0], sizes = [1, 256], strides = [1, 1]} : vector<12x256xf32> to vector<1x256xf32>
    %82 = arith.truncf %81 : vector<1x256xf32> to vector<1x256xbf16>
    %c0_37 = arith.constant 0 : index
    %c0_38 = arith.constant 0 : index
    %c0_39 = arith.constant 0 : index
    %83 = vector.load %arg4[%c0_37, %c0_38, %c0_39] : memref<12x256x64xbf16, #tpu.memory_space<vmem>>, vector<1x256x64xbf16>
    %84 = vector.shape_cast %83 : vector<1x256x64xbf16> to vector<256x64xbf16>
    %cst_40 = arith.constant dense<0.000000e+00> : vector<1x64xf32>
    %85 = tpu.matmul %82, %84, %cst_40 {dimension_numbers = #tpu.dot_dimension_numbers<[1], [0], [0], [1], [0, 0, 1, 1], [], []>} : vector<1x256xbf16>, vector<256x64xbf16>, vector<1x64xf32> -> vector<1x64xf32>
    %86 = arith.addf %80, %85 : vector<1x64xf32>
    %87 = vector.extract_strided_slice %79 {offsets = [1, 0], sizes = [1, 256], strides = [1, 1]} : vector<12x256xf32> to vector<1x256xf32>
    %88 = arith.truncf %87 : vector<1x256xf32> to vector<1x256xbf16>
    %c1_41 = arith.constant 1 : index
    %c0_42 = arith.constant 0 : index
    %c0_43 = arith.constant 0 : index
    %89 = vector.load %arg4[%c1_41, %c0_42, %c0_43] : memref<12x256x64xbf16, #tpu.memory_space<vmem>>, vector<1x256x64xbf16>
    %90 = vector.shape_cast %89 : vector<1x256x64xbf16> to vector<256x64xbf16>
    %cst_44 = arith.constant dense<0.000000e+00> : vector<1x64xf32>
    %91 = tpu.matmul %88, %90, %cst_44 {dimension_numbers = #tpu.dot_dimension_numbers<[1], [0], [0], [1], [0, 0, 1, 1], [], []>} : vector<1x256xbf16>, vector<256x64xbf16>, vector<1x64xf32> -> vector<1x64xf32>
    %92 = arith.addf %86, %91 : vector<1x64xf32>
    %93 = vector.extract_strided_slice %79 {offsets = [2, 0], sizes = [1, 256], strides = [1, 1]} : vector<12x256xf32> to vector<1x256xf32>
    %94 = arith.truncf %93 : vector<1x256xf32> to vector<1x256xbf16>
    %c2_45 = arith.constant 2 : index
    %c0_46 = arith.constant 0 : index
    %c0_47 = arith.constant 0 : index
    %95 = vector.load %arg4[%c2_45, %c0_46, %c0_47] : memref<12x256x64xbf16, #tpu.memory_space<vmem>>, vector<1x256x64xbf16>
    %96 = vector.shape_cast %95 : vector<1x256x64xbf16> to vector<256x64xbf16>
    %cst_48 = arith.constant dense<0.000000e+00> : vector<1x64xf32>
    %97 = tpu.matmul %94, %96, %cst_48 {dimension_numbers = #tpu.dot_dimension_numbers<[1], [0], [0], [1], [0, 0, 1, 1], [], []>} : vector<1x256xbf16>, vector<256x64xbf16>, vector<1x64xf32> -> vector<1x64xf32>
    %98 = arith.addf %92, %97 : vector<1x64xf32>
    %99 = vector.extract_strided_slice %79 {offsets = [3, 0], sizes = [1, 256], strides = [1, 1]} : vector<12x256xf32> to vector<1x256xf32>
    %100 = arith.truncf %99 : vector<1x256xf32> to vector<1x256xbf16>
    %c3_49 = arith.constant 3 : index
    %c0_50 = arith.constant 0 : index
    %c0_51 = arith.constant 0 : index
    %101 = vector.load %arg4[%c3_49, %c0_50, %c0_51] : memref<12x256x64xbf16, #tpu.memory_space<vmem>>, vector<1x256x64xbf16>
    %102 = vector.shape_cast %101 : vector<1x256x64xbf16> to vector<256x64xbf16>
    %cst_52 = arith.constant dense<0.000000e+00> : vector<1x64xf32>
    %103 = tpu.matmul %100, %102, %cst_52 {dimension_numbers = #tpu.dot_dimension_numbers<[1], [0], [0], [1], [0, 0, 1, 1], [], []>} : vector<1x256xbf16>, vector<256x64xbf16>, vector<1x64xf32> -> vector<1x64xf32>
    %104 = arith.addf %98, %103 : vector<1x64xf32>
    %105 = vector.extract_strided_slice %79 {offsets = [4, 0], sizes = [1, 256], strides = [1, 1]} : vector<12x256xf32> to vector<1x256xf32>
    %106 = arith.truncf %105 : vector<1x256xf32> to vector<1x256xbf16>
    %c4_53 = arith.constant 4 : index
    %c0_54 = arith.constant 0 : index
    %c0_55 = arith.constant 0 : index
    %107 = vector.load %arg4[%c4_53, %c0_54, %c0_55] : memref<12x256x64xbf16, #tpu.memory_space<vmem>>, vector<1x256x64xbf16>
    %108 = vector.shape_cast %107 : vector<1x256x64xbf16> to vector<256x64xbf16>
    %cst_56 = arith.constant dense<0.000000e+00> : vector<1x64xf32>
    %109 = tpu.matmul %106, %108, %cst_56 {dimension_numbers = #tpu.dot_dimension_numbers<[1], [0], [0], [1], [0, 0, 1, 1], [], []>} : vector<1x256xbf16>, vector<256x64xbf16>, vector<1x64xf32> -> vector<1x64xf32>
    %110 = arith.addf %104, %109 : vector<1x64xf32>
    %111 = vector.extract_strided_slice %79 {offsets = [5, 0], sizes = [1, 256], strides = [1, 1]} : vector<12x256xf32> to vector<1x256xf32>
    %112 = arith.truncf %111 : vector<1x256xf32> to vector<1x256xbf16>
    %c5_57 = arith.constant 5 : index
    %c0_58 = arith.constant 0 : index
    %c0_59 = arith.constant 0 : index
    %113 = vector.load %arg4[%c5_57, %c0_58, %c0_59] : memref<12x256x64xbf16, #tpu.memory_space<vmem>>, vector<1x256x64xbf16>
    %114 = vector.shape_cast %113 : vector<1x256x64xbf16> to vector<256x64xbf16>
    %cst_60 = arith.constant dense<0.000000e+00> : vector<1x64xf32>
    %115 = tpu.matmul %112, %114, %cst_60 {dimension_numbers = #tpu.dot_dimension_numbers<[1], [0], [0], [1], [0, 0, 1, 1], [], []>} : vector<1x256xbf16>, vector<256x64xbf16>, vector<1x64xf32> -> vector<1x64xf32>
    %116 = arith.addf %110, %115 : vector<1x64xf32>
    %117 = vector.extract_strided_slice %79 {offsets = [6, 0], sizes = [1, 256], strides = [1, 1]} : vector<12x256xf32> to vector<1x256xf32>
    %118 = arith.truncf %117 : vector<1x256xf32> to vector<1x256xbf16>
    %c6_61 = arith.constant 6 : index
    %c0_62 = arith.constant 0 : index
    %c0_63 = arith.constant 0 : index
    %119 = vector.load %arg4[%c6_61, %c0_62, %c0_63] : memref<12x256x64xbf16, #tpu.memory_space<vmem>>, vector<1x256x64xbf16>
    %120 = vector.shape_cast %119 : vector<1x256x64xbf16> to vector<256x64xbf16>
    %cst_64 = arith.constant dense<0.000000e+00> : vector<1x64xf32>
    %121 = tpu.matmul %118, %120, %cst_64 {dimension_numbers = #tpu.dot_dimension_numbers<[1], [0], [0], [1], [0, 0, 1, 1], [], []>} : vector<1x256xbf16>, vector<256x64xbf16>, vector<1x64xf32> -> vector<1x64xf32>
    %122 = arith.addf %116, %121 : vector<1x64xf32>
    %123 = vector.extract_strided_slice %79 {offsets = [7, 0], sizes = [1, 256], strides = [1, 1]} : vector<12x256xf32> to vector<1x256xf32>
    %124 = arith.truncf %123 : vector<1x256xf32> to vector<1x256xbf16>
    %c7_65 = arith.constant 7 : index
    %c0_66 = arith.constant 0 : index
    %c0_67 = arith.constant 0 : index
    %125 = vector.load %arg4[%c7_65, %c0_66, %c0_67] : memref<12x256x64xbf16, #tpu.memory_space<vmem>>, vector<1x256x64xbf16>
    %126 = vector.shape_cast %125 : vector<1x256x64xbf16> to vector<256x64xbf16>
    %cst_68 = arith.constant dense<0.000000e+00> : vector<1x64xf32>
    %127 = tpu.matmul %124, %126, %cst_68 {dimension_numbers = #tpu.dot_dimension_numbers<[1], [0], [0], [1], [0, 0, 1, 1], [], []>} : vector<1x256xbf16>, vector<256x64xbf16>, vector<1x64xf32> -> vector<1x64xf32>
    %128 = arith.addf %122, %127 : vector<1x64xf32>
    %129 = vector.extract_strided_slice %79 {offsets = [8, 0], sizes = [1, 256], strides = [1, 1]} : vector<12x256xf32> to vector<1x256xf32>
    %130 = arith.truncf %129 : vector<1x256xf32> to vector<1x256xbf16>
    %c8_69 = arith.constant 8 : index
    %c0_70 = arith.constant 0 : index
    %c0_71 = arith.constant 0 : index
    %131 = vector.load %arg4[%c8_69, %c0_70, %c0_71] : memref<12x256x64xbf16, #tpu.memory_space<vmem>>, vector<1x256x64xbf16>
    %132 = vector.shape_cast %131 : vector<1x256x64xbf16> to vector<256x64xbf16>
    %cst_72 = arith.constant dense<0.000000e+00> : vector<1x64xf32>
    %133 = tpu.matmul %130, %132, %cst_72 {dimension_numbers = #tpu.dot_dimension_numbers<[1], [0], [0], [1], [0, 0, 1, 1], [], []>} : vector<1x256xbf16>, vector<256x64xbf16>, vector<1x64xf32> -> vector<1x64xf32>
    %134 = arith.addf %128, %133 : vector<1x64xf32>
    %135 = vector.extract_strided_slice %79 {offsets = [9, 0], sizes = [1, 256], strides = [1, 1]} : vector<12x256xf32> to vector<1x256xf32>
    %136 = arith.truncf %135 : vector<1x256xf32> to vector<1x256xbf16>
    %c9 = arith.constant 9 : index
    %c0_73 = arith.constant 0 : index
    %c0_74 = arith.constant 0 : index
    %137 = vector.load %arg4[%c9, %c0_73, %c0_74] : memref<12x256x64xbf16, #tpu.memory_space<vmem>>, vector<1x256x64xbf16>
    %138 = vector.shape_cast %137 : vector<1x256x64xbf16> to vector<256x64xbf16>
    %cst_75 = arith.constant dense<0.000000e+00> : vector<1x64xf32>
    %139 = tpu.matmul %136, %138, %cst_75 {dimension_numbers = #tpu.dot_dimension_numbers<[1], [0], [0], [1], [0, 0, 1, 1], [], []>} : vector<1x256xbf16>, vector<256x64xbf16>, vector<1x64xf32> -> vector<1x64xf32>
    %140 = arith.addf %134, %139 : vector<1x64xf32>
    %141 = vector.extract_strided_slice %79 {offsets = [10, 0], sizes = [1, 256], strides = [1, 1]} : vector<12x256xf32> to vector<1x256xf32>
    %142 = arith.truncf %141 : vector<1x256xf32> to vector<1x256xbf16>
    %c10 = arith.constant 10 : index
    %c0_76 = arith.constant 0 : index
    %c0_77 = arith.constant 0 : index
    %143 = vector.load %arg4[%c10, %c0_76, %c0_77] : memref<12x256x64xbf16, #tpu.memory_space<vmem>>, vector<1x256x64xbf16>
    %144 = vector.shape_cast %143 : vector<1x256x64xbf16> to vector<256x64xbf16>
    %cst_78 = arith.constant dense<0.000000e+00> : vector<1x64xf32>
    %145 = tpu.matmul %142, %144, %cst_78 {dimension_numbers = #tpu.dot_dimension_numbers<[1], [0], [0], [1], [0, 0, 1, 1], [], []>} : vector<1x256xbf16>, vector<256x64xbf16>, vector<1x64xf32> -> vector<1x64xf32>
    %146 = arith.addf %140, %145 : vector<1x64xf32>
    %147 = vector.extract_strided_slice %79 {offsets = [11, 0], sizes = [1, 256], strides = [1, 1]} : vector<12x256xf32> to vector<1x256xf32>
    %148 = arith.truncf %147 : vector<1x256xf32> to vector<1x256xbf16>
    %c11 = arith.constant 11 : index
    %c0_79 = arith.constant 0 : index
    %c0_80 = arith.constant 0 : index
    %149 = vector.load %arg4[%c11, %c0_79, %c0_80] : memref<12x256x64xbf16, #tpu.memory_space<vmem>>, vector<1x256x64xbf16>
    %150 = vector.shape_cast %149 : vector<1x256x64xbf16> to vector<256x64xbf16>
    %cst_81 = arith.constant dense<0.000000e+00> : vector<1x64xf32>
    %151 = tpu.matmul %148, %150, %cst_81 {dimension_numbers = #tpu.dot_dimension_numbers<[1], [0], [0], [1], [0, 0, 1, 1], [], []>} : vector<1x256xbf16>, vector<256x64xbf16>, vector<1x64xf32> -> vector<1x64xf32>
    %152 = arith.addf %146, %151 : vector<1x64xf32>
    %cst_82 = arith.constant 0.000000e+00 : f32
    %153 = vector.broadcast %cst_82 : f32 to vector<1x64xf32>
    %154 = arith.maximumf %152, %153 : vector<1x64xf32>
    %155 = arith.truncf %154 : vector<1x64xf32> to vector<1x64xbf16>
    %c0_83 = arith.constant 0 : index
    %c0_84 = arith.constant 0 : index
    %156 = vector.load %arg6[%c0_83, %c0_84] : memref<64x128xbf16, #tpu.memory_space<vmem>>, vector<64x128xbf16>
    %cst_85 = arith.constant dense<0.000000e+00> : vector<1x128xf32>
    %157 = tpu.matmul %155, %156, %cst_85 {dimension_numbers = #tpu.dot_dimension_numbers<[1], [0], [0], [1], [0, 0, 1, 1], [], []>} : vector<1x64xbf16>, vector<64x128xbf16>, vector<1x128xf32> -> vector<1x128xf32>
    %c0_86 = arith.constant 0 : index
    %c0_87 = arith.constant 0 : index
    %158 = vector.load %arg7[%c0_86, %c0_87] : memref<1x128xf32, #tpu.memory_space<vmem>>, vector<1x128xf32>
    %159 = arith.addf %157, %158 : vector<1x128xf32>
    %cst_88 = arith.constant dense<0xFF800000> : vector<1xf32>
    %160 = vector.multi_reduction <maximumf>, %159, %cst_88 [1] : vector<1x128xf32> to vector<1xf32>
    %161 = vector.shape_cast %160 : vector<1xf32> to vector<1x1xf32>
    %162 = vector.broadcast %161 : vector<1x1xf32> to vector<1x128xf32>
    %163 = arith.subf %159, %162 : vector<1x128xf32>
    %164 = math.exp %163 : vector<1x128xf32>
    %cst_89 = arith.constant dense<0.000000e+00> : vector<1xf32>
    %165 = vector.multi_reduction <add>, %164, %cst_89 [1] : vector<1x128xf32> to vector<1xf32>
    %166 = vector.shape_cast %165 : vector<1xf32> to vector<1x1xf32>
    %167 = math.log %166 : vector<1x1xf32>
    %168 = vector.broadcast %167 : vector<1x1xf32> to vector<1x128xf32>
    %169 = arith.subf %163, %168 : vector<1x128xf32>
    %c0_90 = arith.constant 0 : index
    %c0_91 = arith.constant 0 : index
    %c0_92 = arith.constant 0 : index
    %170 = vector.load %arg8[%c0_90, %c0_91, %c0_92] : memref<1x1x128xf32, #tpu.memory_space<vmem>>, vector<1x1x128xf32>
    %171 = vector.shape_cast %170 : vector<1x1x128xf32> to vector<1x128xf32>
    %172 = vector.shape_cast %169 : vector<1x128xf32> to vector<1x1x128xf32>
    tpu.vector_store %arg8[%c0_90, %c0_91, %c0_92], %172 {strides = array<i32>} : memref<1x1x128xf32, #tpu.memory_space<vmem>>, vector<1x1x128xf32>,
    return
  }
  func.func @transform_0(%arg0: i32) -> (i32, i32, i32) {
    %c0_i32 = arith.constant 0 : i32
    %c0_i32_0 = arith.constant 0 : i32
    %c0_i32_1 = arith.constant 0 : i32
    return %arg0, %c0_i32, %c0_i32_0 : i32, i32, i32
  }
  func.func @transform_1(%arg0: i32) -> (i32, i32, i32) {
    %c0_i32 = arith.constant 0 : i32
    %c0_i32_0 = arith.constant 0 : i32
    %c0_i32_1 = arith.constant 0 : i32
    %c0_i32_2 = arith.constant 0 : i32
    return %c0_i32, %c0_i32_0, %c0_i32_1 : i32, i32, i32
  }
  func.func @transform_2(%arg0: i32) -> (i32, i32) {
    %c0_i32 = arith.constant 0 : i32
    %c0_i32_0 = arith.constant 0 : i32
    %c0_i32_1 = arith.constant 0 : i32
    return %c0_i32, %c0_i32_0 : i32, i32
  }
  func.func @transform_3(%arg0: i32) -> (i32, i32, i32) {
    %c0_i32 = arith.constant 0 : i32
    %c0_i32_0 = arith.constant 0 : i32
    %c0_i32_1 = arith.constant 0 : i32
    %c0_i32_2 = arith.constant 0 : i32
    return %c0_i32, %c0_i32_0, %c0_i32_1 : i32, i32, i32
  }
  func.func @transform_4(%arg0: i32) -> (i32, i32) {
    %c0_i32 = arith.constant 0 : i32
    %c0_i32_0 = arith.constant 0 : i32
    %c0_i32_1 = arith.constant 0 : i32
    return %c0_i32, %c0_i32_0 : i32, i32
  }
  func.func @transform_5(%arg0: i32) -> (i32, i32) {
    %c0_i32 = arith.constant 0 : i32
    %c0_i32_0 = arith.constant 0 : i32
    %c0_i32_1 = arith.constant 0 : i32
    return %c0_i32, %c0_i32_0 : i32, i32
  }
  func.func @transform_6(%arg0: i32) -> (i32, i32) {
    %c0_i32 = arith.constant 0 : i32
    %c0_i32_0 = arith.constant 0 : i32
    %c0_i32_1 = arith.constant 0 : i32
    return %c0_i32, %c0_i32_0 : i32, i32
  }
  func.func @transform_7(%arg0: i32) -> (i32, i32, i32) {
    %c0_i32 = arith.constant 0 : i32
    %c0_i32_0 = arith.constant 0 : i32
    %c0_i32_1 = arith.constant 0 : i32
    return %arg0, %c0_i32, %c0_i32_0 : i32, i32, i32
  }
}

</mosaic_0001>

<bundles_post_ra>
// kernel: gabor_network_forward.1
= control target key start
LH: loop header
LB: loop body
LE: loop exit
PB: predicated region body
PF: predicated region fallthrough
CT: control target
= control target key end

     0   :  { %12 = vsyncpa [#allocation3], 0  ;;  %s7254_s0 = inlined_call_operand.vmem [shape: f32[2,32,32], index: 0, kind: input, shape index: {}]   ;;  %s7255_s1 = inlined_call_operand.vmem [shape: bf16[9,32,512], index: 1, kind: input, shape index: {}]   ;;  %s7256_s2 = inlined_call_operand.vmem [shape: f32[1,256], index: 2, kind: input, shape index: {}]   ;;  %s7257_s3 = inlined_call_operand.vmem [shape: bf16[12,256,64], index: 3, kind: input, shape index: {}]   ;;  %s7258_s4 = inlined_call_operand.vmem [shape: f32[1,64], index: 4, kind: input, shape index: {}]   ;;  %s7259_s5 = inlined_call_operand.vmem [shape: bf16[64,128], index: 5, kind: input, shape index: {}]   ;;  %s7260_s6 = inlined_call_operand.vmem [shape: f32[1,128], index: 6, kind: input, shape index: {}]   ;;  %s7261_s7 = inlined_call_operand.hbm [shape: f32[2,1,128], index: 7, kind: output, shape index: {}]  }
   0x1   :  { %14 = vsyncpa [#allocation3 + $0x1], 0  ;;  %s5777_s24 = smov 0   ;;  %s5779_s25 = smov 0  }
   0x2   :  { %s5781_s26 = smov 0   ;;  %s5783_s27 = smov 0  }
   0x3 LB: > { %s5798_s28 = sadd.s32 4294967295, %s5734_s27   ;;  %s3778_s29 = sadd.s32 4294967294, %s5734_s27   ;;  %s5734_s27 = sphi %s5783_s27, %s7267_s27   ;;  %s5730_s26 = sphi %s5781_s26, %s7266_s26   ;;  %s5726_s25 = sphi %s5779_s25, %s7265_s25   ;;  %s5722_s24 = sphi %s5777_s24, %s7264_s24  }
   0x4   : > { %s5802_s30 = sadd.s32 1, %s5734_s27   ;;  %s179_s8 = sadd.s32 1, %s5730_s26 }
   0x5   : > { %s176_s9 = ssub.s32 %s5734_s27, %s5802_s30  ;;  %p189_p0 = scmp.ne.s32.totalorder %s5730_s26, %s5726_s25 }
   0x6   : > { %p177_p1 = scmp.eq.s32.totalorder %s176_s9, 0  ;;  %p190_p2 = scmp.eq.s32.totalorder %s5798_s28, 1 }
   0x7   : > { %p195_p3 = scmp.ne.s32.totalorder %s5726_s25, %s5722_s24  ;;  %p196_p4 = scmp.eq.s32.totalorder %s3778_s29, 1 }
   0x8   : > { %s5813_s10 = scalar_select %p177_p1, %s5730_s26, %s179_s8  }
   0x9   : > { %p5815_p5 = por %p190_p2, %p189_p0  ;;  %p5819_p6 = por %p196_p4, %p195_p3 }
   0xa   : > { %p3781_p7 = scmp.ge.s32.totalorder %s5734_s27, 1  ;;  %p240_p8 = scmp.lt.s32.totalorder %s5734_s27, 3 }
   0xc   : > { %p241_p9 = pnand %p3781_p7, %p240_p8 }
   0xd   : > { %p271_p10 = scmp.lt.s32.totalorder (!%p241_p9), %s5798_s28, 1  ;;  %s269_s18 = sand.u32 (!%p241_p9), 1, %s5726_s25  }
   0xe   : > { %244 = sbr.rel (%p241_p9) target bundleno = 1253 (0x4e5), region = 48  ;;  %s3719_s21 = scalar_lea.hbm (!%p241_p9), %s7261_s7, %s5798_s28 }
   0xf   : > { %s270_s22 = scalar_lea.vmem (!%p241_p9), [#allocation2], %s269_s18  ;;  %s3723_s8 = sshll.u32 (!%p241_p9), %s3719_s21, 4  ;;  %s3724_s8 = int_to_ptr.hbm [resolvable:$true] %s3723_s8 }
  0x10   : > { %s3721_s29 = sshll.u32 (!%p241_p9), %s270_s22, 4  ;;  %s3711_s9 = scalar_lea.sflag (!%p241_p9), [#allocation3], %s269_s18  ;;  %s3722_s29 = int_to_ptr.vmem [resolvable:$true] %s3721_s29 }
  0x11   : > { %s5686_s13 = sshra.s32 (!%p241_p9), %s3724_s8, 4  ;;  %s5687_s13 = int_to_ptr.hbm [resolvable:$true] %s5686_s13 }
  0x12   : > { %p5693_p0 = scmp.lt.s32.totalorder (!%p241_p9), %s5687_s13, %s7261_s7 }
  0x13   : > { %v3810_v0 = vld [vmem:[%s7255_s1 + $0x60] sm:$0xf]  ;;  %v5374_v1 = vld [vmem:[%s7255_s1 + $0x6c] sm:$0xf0]  ;;  %v5372_v2 = vld [vmem:[%s7255_s1 + $0x64] sm:$0xf] }
  0x14   : > { %v3811_v3 = vor.u32 %v5374_v1, %v3810_v0  ;;  %v3812_v4 = vld [vmem:[%s7255_s1 + $0x70] sm:$0xf0]  ;;  %v3818_v5 = vld [vmem:[%s7255_s1 + $0x68] sm:$0xf]  ;;  %v5375_v6 = vld [vmem:[%s7255_s1 + $0x74] sm:$0xf0] }
  0x15   : > { %v3815_v7 = vor.u32 %v5372_v2, %v3812_v4  ;;  %v3819_v8 = vor.u32 %v5375_v6, %v3818_v5  ;;  %v5373_v9 = vld [vmem:[%s7255_s1 + $0x6c] sm:$0xf]  ;;  %v3820_v10 = vld [vmem:[%s7255_s1 + $0x78] sm:$0xf0]  ;;  %v3794_v11 = vld [vmem:[%s7255_s1 + $0x40] sm:$0xf] }
  0x16   : > { %370 = vmatpush.bf16.msra.mxu0 %v3811_v3  ;;  %v3823_v12 = vor.u32 %v5373_v9, %v3820_v10  ;;  %v5370_v13 = vld [vmem:[%s7255_s1 + $0x4c] sm:$0xf0]  ;;  %v5368_v14 = vld [vmem:[%s7255_s1 + $0x44] sm:$0xf]  ;;  %v3796_v15 = vld [vmem:[%s7255_s1 + $0x50] sm:$0xf0] }
  0x17   : > { %388 = vmatpush.bf16.msra.mxu1 %v3815_v7  ;;  %406 = vmatpush.bf16.msra.mxu2 %v3819_v8  ;;  %v3795_v16 = vor.u32 %v5370_v13, %v3794_v11  ;;  %v3799_v17 = vor.u32 %v5368_v14, %v3796_v15  ;;  %v3802_v18 = vld [vmem:[%s7255_s1 + $0x48] sm:$0xf]  ;;  %v5371_v19 = vld [vmem:[%s7255_s1 + $0x54] sm:$0xf0]  ;;  %v5369_v20 = vld [vmem:[%s7255_s1 + $0x4c] sm:$0xf] }
  0x18   : > { %424 = vmatpush.bf16.msra.mxu3 %v3823_v12  ;;  %v3803_v21 = vor.u32 %v5371_v19, %v3802_v18  ;;  %v3804_v22 = vld [vmem:[%s7255_s1 + $0x58] sm:$0xf0]  ;;  %v3850_v24 = vld [vmem:[%s7255_s1 + $0x20] sm:$0xf]  ;;  %v5366_v25 = vld [vmem:[%s7255_s1 + $0x2c] sm:$0xf0] }
  0x19   : > { %v3807_v23 = vor.u32 %v5369_v20, %v3804_v22  ;;  %v5364_v26 = vld [vmem:[%s7255_s1 + $0x24] sm:$0xf]  ;;  %s272_s23 = scalar_select %p271_p10, %s5798_s28, 1  ;;  %v3851_v27 = vor.u32 %v5366_v25, %v3850_v24  ;;  %v3852_v28 = vld [vmem:[%s7255_s1 + $0x30] sm:$0xf0]  ;;  %vm357_vm1 = vcmask 261120  }
  0x1a   : > { %371 = vmatpush.bf16.msra.mxu0 %v3795_v16  ;;  %v3858_v29 = vld [vmem:[%s7255_s1 + $0x28] sm:$0xf]  ;;  %v3855_v30 = vor.u32 %v5364_v26, %v3852_v28  ;;  %v5367_v31 = vld [vmem:[%s7255_s1 + $0x34] sm:$0xf0]  ;;  %v5365_v32 = vld [vmem:[%s7255_s1 + $0x2c] sm:$0xf] }
  0x1b   : > { %389 = vmatpush.bf16.msra.mxu1 %v3799_v17  ;;  %407 = vmatpush.bf16.msra.mxu2 %v3803_v21  ;;  %v3860_v33 = vld [vmem:[%s7255_s1 + $0x38] sm:$0xf0]  ;;  %s5359_s20 = sshll.u32 %s272_s23, 5  ;;  %v3859_v34 = vor.u32 %v5367_v31, %v3858_v29  ;;  %v3834_v36 = vld [vmem:[%s7255_s1] sm:$0xf]  ;;  %vm564_vm2 = vcmask 1046528  }
  0x1c   : > { %425 = vmatpush.bf16.msra.mxu3 %v3807_v23  ;;  %v3863_v35 = vor.u32 %v5365_v32, %v3860_v33  ;;  %v5362_v37 = vld [vmem:[%s7255_s1 + $0xc] sm:$0xf0]  ;;  %s275_s14 = scalar_lea.vmem %s7254_s0, %s5359_s20  ;;  %v5360_v39 = vld [vmem:[%s7255_s1 + $0x4] sm:$0xf]  ;;  %v3836_v40 = vld [vmem:[%s7255_s1 + $0x10] sm:$0xf0] }
  0x1d   : > { %v3835_v38 = vor.u32 %v5362_v37, %v3834_v36  ;;  %v3842_v41 = vld [vmem:[%s7255_s1 + $0x8] sm:$0xf]  ;;  %v277_v42 = vld [vmem:[%s275_s14] sm:$0xff]  ;;  %v5919_v44 = vld [vmem:[%s275_s14 + $0x10] sm:$0xff]  ;;  %v3839_v45 = vor.u32 %v5360_v39, %v3836_v40  ;;  %vm301_vm0 = vsmask.f32 7424 }
  0x1e   : > { %487 = vmatpush.bf16.msrb.mxu0 %v3851_v27  ;;  %v5917_v43 = vld [vmem:[%s275_s14 + $0x8] sm:$0xff]  ;;  %v5921_v46 = vld [vmem:[%s275_s14 + $0x18] sm:$0xff]  ;;  %v3898_v63 = vld [vmem:[%s7255_s1 + $0xa0] sm:$0xf]  ;;  %v282_v23 = vpack.c.bf16 %v5919_v44, %v5919_v44  ;;  %vm707_vm3 = vsmask.f32 6400 }
  0x1f   : > { %505 = vmatpush.bf16.msrb.mxu1 %v3855_v30  ;;  %523 = vmatpush.bf16.msrb.mxu2 %v3859_v34  ;;  %v5924_v47 = vpack.c.bf16 %v5917_v43, %v277_v42  ;;  %v5363_v48 = vld [vmem:[%s7255_s1 + $0x14] sm:$0xf0]  ;;  %v5361_v49 = vld [vmem:[%s7255_s1 + $0xc] sm:$0xf]  ;;  %v5934_v50 = vpack.c.bf16 %v5921_v46, %v5919_v44  ;;  %v3844_v52 = vld [vmem:[%s7255_s1 + $0x18] sm:$0xf0] }
  0x20   : > { %541 = vmatpush.bf16.msrb.mxu3 %v3863_v35  ;;  %v3843_v51 = vor.u32 %v5363_v48, %v3842_v41  ;;  %v3847_v55 = vor.u32 %v5361_v49, %v3844_v52  ;;  %v5382_v0 = vld [vmem:[%s7255_s1 + $0xac] sm:$0xf0]  ;;  %v5380_v1 = vld [vmem:[%s7255_s1 + $0xa4] sm:$0xf]  ;;  %v3900_v3 = vld [vmem:[%s7255_s1 + $0xb0] sm:$0xf0] }
  0x21   : > { %v5940_v53 = vshrl.u32 %v5924_v47, 16  ;;  %v5943_v54 = vshll.u32 %v5924_v47, 16  ;;  %v5946_v56 = vshll.u32 %v5934_v50, 16  ;;  %v5956_v61 = vshrl.u32 %v5934_v50, 16  ;;  %v3906_v4 = vld [vmem:[%s7255_s1 + $0xa8] sm:$0xf] }
  0x22   : > { %488 = vmatpush.bf16.msrb.mxu0 %v3835_v38  ;;  %v3899_v2 = vor.u32 %v5382_v0, %v3898_v63  ;;  %v5383_v5 = vld [vmem:[%s7255_s1 + $0xb4] sm:$0xf0]  ;;  %v3903_v6 = vor.u32 %v5380_v1, %v3900_v3  ;;  %v5381_v8 = vld [vmem:[%s7255_s1 + $0xac] sm:$0xf]  ;;  %v3908_v9 = vld [vmem:[%s7255_s1 + $0xb8] sm:$0xf0] }
  0x23   : > { %506 = vmatpush.bf16.msrb.mxu1 %v3839_v45  ;;  %524 = vmatpush.bf16.msrb.mxu2 %v3843_v51  ;;  %v307_v57 = vrot.slane %v5943_v54, 1  ;;  %v312_v58 = vrot.slane %v5946_v56, 1  ;;  %v3907_v7 = vor.u32 %v5383_v5, %v3906_v4  ;;  %v3882_v10 = vld [vmem:[%s7255_s1 + $0x80] sm:$0xf]  ;;  %v3911_v11 = vor.u32 %v5381_v8, %v3908_v9  ;;  %v5378_v12 = vld [vmem:[%s7255_s1 + $0x8c] sm:$0xf0] }
  0x24   : > { %542 = vmatpush.bf16.msrb.mxu3 %v3847_v55  ;;  %v5376_v13 = vld [vmem:[%s7255_s1 + $0x84] sm:$0xf]  ;;  %v3884_v14 = vld [vmem:[%s7255_s1 + $0x90] sm:$0xf0]  ;;  %v3883_v15 = vor.u32 %v5378_v12, %v3882_v10  ;;  %v3890_v17 = vld [vmem:[%s7255_s1 + $0x88] sm:$0xf] }
  0x25   : > { %v308_v59 = vor.u32 %v307_v57, %v5940_v53  ;;  %v316_v62 = vor.u32 %v5956_v61, %v312_v58  ;;  %v3887_v16 = vor.u32 %v5376_v13, %v3884_v14  ;;  %v5379_v18 = vld [vmem:[%s7255_s1 + $0x94] sm:$0xf0]  ;;  %v5377_v19 = vld [vmem:[%s7255_s1 + $0x8c] sm:$0xf]  ;;  %v3892_v21 = vld [vmem:[%s7255_s1 + $0x98] sm:$0xf0] }
  0x26   : > { %v3891_v20 = vor.u32 %v5379_v18, %v3890_v17  ;;  %v3895_v22 = vor.u32 %v5377_v19, %v3892_v21  ;;  %v3946_v24 = vld [vmem:[%s7255_s1 + $0xe0] sm:$0xf]  ;;  %v5390_v25 = vld [vmem:[%s7255_s1 + $0xec] sm:$0xf0]  ;;  %v5388_v26 = vld [vmem:[%s7255_s1 + $0xe4] sm:$0xf] }
  0x27   : > { %v313_v60 = vsel %vm301_vm0, %v308_v59, %v312_v58  ;;  %v3947_v27 = vor.u32 %v5390_v25, %v3946_v24  ;;  %v3948_v28 = vld [vmem:[%s7255_s1 + $0xf0] sm:$0xf0]  ;;  %v3954_v29 = vld [vmem:[%s7255_s1 + $0xe8] sm:$0xf]  ;;  %v5391_v30 = vld [vmem:[%s7255_s1 + $0xf4] sm:$0xf0] }
  0x28   : > { %3824 = vmatmul.msk.bf16.vlgmr.msra.gmra.mxu0 %vm357_vm1, %v313_v60  ;;  %3826 = vmatmul.msk.bf16.vlgmr.msra.gmra.mxu1 %vm357_vm1, %v313_v60  ;;  %v3951_v31 = vor.u32 %v5388_v26, %v3948_v28  ;;  %v3955_v32 = vor.u32 %v5391_v30, %v3954_v29  ;;  %v5389_v33 = vld [vmem:[%s7255_s1 + $0xec] sm:$0xf]  ;;  %v3956_v34 = vld [vmem:[%s7255_s1 + $0xf8] sm:$0xf0]  ;;  %v3930_v35 = vld [vmem:[%s7255_s1 + $0xc0] sm:$0xf] }
  0x29   : > { %3828 = vmatmul.msk.bf16.vlgmr.msra.gmra.mxu2 %vm357_vm1, %v313_v60  ;;  %3830 = vmatmul.msk.bf16.vlgmr.msra.gmra.mxu3 %vm357_vm1, %v313_v60  ;;  %v3959_v36 = vor.u32 %v5389_v33, %v3956_v34  ;;  %v5386_v37 = vld [vmem:[%s7255_s1 + $0xcc] sm:$0xf0]  ;;  %v5384_v38 = vld [vmem:[%s7255_s1 + $0xc4] sm:$0xf]  ;;  %v3932_v39 = vld [vmem:[%s7255_s1 + $0xd0] sm:$0xf0] }
  0x2a   : > { %620 = vmatpush.bf16.msra.mxu0 %v3899_v2  ;;  %638 = vmatpush.bf16.msra.mxu1 %v3903_v6  ;;  %v3931_v40 = vor.u32 %v5386_v37, %v3930_v35  ;;  %v3935_v41 = vor.u32 %v5384_v38, %v3932_v39  ;;  %v3938_v42 = vld [vmem:[%s7255_s1 + $0xc8] sm:$0xf]  ;;  %v5387_v45 = vld [vmem:[%s7255_s1 + $0xd4] sm:$0xf0]  ;;  %v5385_v48 = vld [vmem:[%s7255_s1 + $0xcc] sm:$0xf] }
  0x2b   : > { %656 = vmatpush.bf16.msra.mxu2 %v3907_v7  ;;  %674 = vmatpush.bf16.msra.mxu3 %v3911_v11  ;;  %v3939_v49 = vor.u32 %v5387_v45, %v3938_v42  ;;  %v3940_v51 = vld [vmem:[%s7255_s1 + $0xd8] sm:$0xf0]  ;;  %v565_v55 = vrot.slane %v5924_v47, 1  ;;  %v566_v57 = vrot.slane %v5934_v50, 1  ;;  %v3994_v59 = vld [vmem:[%s7255_s1 + $0x120] sm:$0xf] }
  0x2c   : > { %v3943_v52 = vor.u32 %v5385_v48, %v3940_v51  ;;  %v5398_v60 = vld [vmem:[%s7255_s1 + $0x12c] sm:$0xf0]  ;;  %v3996_v0 = vld [vmem:[%s7255_s1 + $0x130] sm:$0xf0]  ;;  %v4002_v1 = vld [vmem:[%s7255_s1 + $0x128] sm:$0xf] }
  0x2d   : > { %v567_v58 = vsel %vm564_vm2, %v565_v55, %v566_v57  ;;  %v3995_v63 = vor.u32 %v5398_v60, %v3994_v59  ;;  %v5399_v2 = vld [vmem:[%s7255_s1 + $0x134] sm:$0xf0]  ;;  %v5397_v5 = vld [vmem:[%s7255_s1 + $0x12c] sm:$0xf]  ;;  %v4004_v6 = vld [vmem:[%s7255_s1 + $0x138] sm:$0xf0] }
  0x2e   : > { %621 = vmatpush.bf16.msra.mxu0 %v3883_v15  ;;  %639 = vmatpush.bf16.msra.mxu1 %v3887_v16  ;;  %v4003_v4 = vor.u32 %v5399_v2, %v4002_v1  ;;  %v4007_v7 = vor.u32 %v5397_v5, %v4004_v6  ;;  %v708_v8 = vrot.slane %v5940_v53, 1  ;;  %v709_v9 = vrot.slane %v5943_v54, 2  ;;  %v3978_v14 = vld [vmem:[%s7255_s1 + $0x100] sm:$0xf]  ;;  %v5394_v15 = vld [vmem:[%s7255_s1 + $0x10c] sm:$0xf0] }
  0x2f   : > { %657 = vmatpush.bf16.msra.mxu2 %v3891_v20  ;;  %675 = vmatpush.bf16.msra.mxu3 %v3895_v22  ;;  %v711_v10 = vrot.slane %v5956_v61, 1  ;;  %v712_v11 = vrot.slane %v5946_v56, 2  ;;  %v5392_v16 = vld [vmem:[%s7255_s1 + $0x104] sm:$0xf]  ;;  %v3979_v17 = vor.u32 %v5394_v15, %v3978_v14  ;;  %v3980_v18 = vld [vmem:[%s7255_s1 + $0x110] sm:$0xf0] }
  0x30   : > { %v710_v12 = vor.u32 %v709_v9, %v708_v8  ;;  %v3986_v19 = vld [vmem:[%s7255_s1 + $0x108] sm:$0xf]  ;;  %v5395_v20 = vld [vmem:[%s7255_s1 + $0x114] sm:$0xf0]  ;;  %v3983_v22 = vor.u32 %v5392_v16, %v3980_v18  ;;  %v5393_v24 = vld [vmem:[%s7255_s1 + $0x10c] sm:$0xf] }
  0x31   : > { %v713_v13 = vor.u32 %v712_v11, %v711_v10  ;;  %v3988_v25 = vld [vmem:[%s7255_s1 + $0x118] sm:$0xf0]  ;;  %v5406_v28 = vld [vmem:[%s7255_s1 + $0x16c] sm:$0xf0]  ;;  %v5404_v29 = vld [vmem:[%s7255_s1 + $0x164] sm:$0xf] }
  0x32   : > { %v3991_v26 = vor.u32 %v5393_v24, %v3988_v25  ;;  %v5407_v33 = vld [vmem:[%s7255_s1 + $0x174] sm:$0xf0]  ;;  %v4052_v37 = vld [vmem:[%s7255_s1 + $0x178] sm:$0xf0]  ;;  %v855_v39 = vrot.slane %v5924_v47, 2  ;;  %vm854_vm4 = vcmask 1045504  }
  0x33   : > { %v714_v21 = vsel %vm707_vm3, %v710_v12, %v713_v13  ;;  %v5402_v42 = vld [vmem:[%s7255_s1 + $0x14c] sm:$0xf0]  ;;  %v5400_v45 = vld [vmem:[%s7255_s1 + $0x144] sm:$0xf]  ;;  %v4034_v51 = vld [vmem:[%s7255_s1 + $0x148] sm:$0xf] }
  0x34   : > { %v998_v11 = vrot.slane %v5940_v53, 2  ;;  %v999_v12 = vrot.slane %v5943_v54, 3  ;;  %v1002_v14 = vrot.slane %v5946_v56, 3  ;;  %v5414_v18 = vld [vmem:[%s7255_s1 + $0x1ac] sm:$0xf0]  ;;  %vm1144_vm6 = vcmask 1044480  }
  0x35   : > { %vm997_vm5 = vsmask.f32 5376  ;;  %vm1287_vm7 = vsmask.f32 4352  ;;  %vm1593_vm10 = vcmask 195584   ;;  %vm3679_vm13 = vcmask 523264  }
  0x36   : > { %vm3696_vm14 = vcmask 1040384   ;;  %s5688_s14 = scalar_lea.hbm %s5687_s13, 1  ;;  %s5692_s28 = scalar_lea.hbm %s7261_s7, 2 }
  0x37   : > { %p5689_p11 = scmp.ne.s32.totalorder %s5687_s13, %s5688_s14  ;;  %p5694_p1 = scmp.lt.s32.totalorder %s5692_s28, %s5688_s14 }
  0x38   : > { %3825 = vmatmul.msk.bf16.gmra.mxu0 %vm357_vm1, %v316_v62  ;;  %3827 = vmatmul.msk.bf16.gmra.mxu1 %vm357_vm1, %v316_v62 }
  0x39   : > { %3829 = vmatmul.msk.bf16.gmra.mxu2 %vm357_vm1, %v316_v62  ;;  %3831 = vmatmul.msk.bf16.gmra.mxu3 %vm357_vm1, %v316_v62  ;;  %v5396_v62 = vld [vmem:[%s7255_s1 + $0x124] sm:$0xf]  ;;  %p5690_p12 = pnand %p5689_p11, %p5815_p5  ;;  %p5695_p2 = por %p5694_p1, %p5693_p0 }
  0x3a   : > { %v3999_v3 = vor.u32 %v5396_v62, %v3996_v0  ;;  %v5401_v62 = vld [vmem:[%s7255_s1 + $0x14c] sm:$0xf] }
  0x3b   : > { %p5691_p13 = pneg %p5690_p12 }
  0x3d   : > { %p5696_p3 = pnand %p5695_p2, %p5691_p13 }
  0x48   : > { %3864 = vmatmul.msk.bf16.vlgmr.msrb.gmra.mxu0 %vm357_vm1, %v5924_v47  ;;  %3866 = vmatmul.msk.bf16.vlgmr.msrb.gmra.mxu1 %vm357_vm1, %v5924_v47 }
  0x49   : > { %3868 = vmatmul.msk.bf16.vlgmr.msrb.gmra.mxu2 %vm357_vm1, %v5924_v47  ;;  %3870 = vmatmul.msk.bf16.vlgmr.msrb.gmra.mxu3 %vm357_vm1, %v5924_v47 }
  0x4a   : > { %767 = vmatpush.bf16.msrb.mxu0 %v3947_v27  ;;  %785 = vmatpush.bf16.msrb.mxu1 %v3951_v31  ;;  %v4042_v27 = vld [vmem:[%s7255_s1 + $0x160] sm:$0xf]  ;;  %v4044_v31 = vld [vmem:[%s7255_s1 + $0x170] sm:$0xf0] }
  0x4b   : > { %803 = vmatpush.bf16.msrb.mxu2 %v3955_v32  ;;  %821 = vmatpush.bf16.msrb.mxu3 %v3959_v36  ;;  %v4043_v30 = vor.u32 %v5406_v28, %v4042_v27  ;;  %v4050_v32 = vld [vmem:[%s7255_s1 + $0x168] sm:$0xf]  ;;  %v4047_v34 = vor.u32 %v5404_v29, %v4044_v31  ;;  %v5405_v36 = vld [vmem:[%s7255_s1 + $0x16c] sm:$0xf]  ;;  %v4100_v27 = vld [vmem:[%s7255_s1 + $0x1b8] sm:$0xf0]  ;;  %v1000_v29 = vor.u32 %v999_v12, %v998_v11 }
  0x4c   : > { %v4051_v35 = vor.u32 %v5407_v33, %v4050_v32  ;;  %v4055_v38 = vor.u32 %v5405_v36, %v4052_v37  ;;  %v4074_v31 = vld [vmem:[%s7255_s1 + $0x180] sm:$0xf]  ;;  %v5410_v32 = vld [vmem:[%s7255_s1 + $0x18c] sm:$0xf0]  ;;  %v5408_v33 = vld [vmem:[%s7255_s1 + $0x184] sm:$0xf] }
  0x4d   : > { %v4075_v36 = vor.u32 %v5410_v32, %v4074_v31  ;;  %v4076_v37 = vld [vmem:[%s7255_s1 + $0x190] sm:$0xf0]  ;;  %v4122_v31 = vld [vmem:[%s7255_s1 + $0x1c0] sm:$0xf]  ;;  %v5418_v32 = vld [vmem:[%s7255_s1 + $0x1cc] sm:$0xf0] }
  0x4e   : > { %768 = vmatpush.bf16.msrb.mxu0 %v3931_v40  ;;  %786 = vmatpush.bf16.msrb.mxu1 %v3935_v41  ;;  %v856_v40 = vrot.slane %v5934_v50, 2  ;;  %v4026_v41 = vld [vmem:[%s7255_s1 + $0x140] sm:$0xf] }
  0x4f   : > { %804 = vmatpush.bf16.msrb.mxu2 %v3939_v49  ;;  %822 = vmatpush.bf16.msrb.mxu3 %v3943_v52  ;;  %v4027_v48 = vor.u32 %v5402_v42, %v4026_v41  ;;  %v4028_v49 = vld [vmem:[%s7255_s1 + $0x150] sm:$0xf0]  ;;  %v5403_v52 = vld [vmem:[%s7255_s1 + $0x154] sm:$0xf0] }
  0x50   : > { %v4031_v59 = vor.u32 %v5400_v45, %v4028_v49  ;;  %v4035_v60 = vor.u32 %v5403_v52, %v4034_v51  ;;  %v4079_v45 = vor.u32 %v5408_v33, %v4076_v37  ;;  %v5409_v49 = vld [vmem:[%s7255_s1 + $0x18c] sm:$0xf]  ;;  %v4084_v51 = vld [vmem:[%s7255_s1 + $0x198] sm:$0xf0]  ;;  %v5416_v33 = vld [vmem:[%s7255_s1 + $0x1c4] sm:$0xf] }
  0x51   : > { %v5419_v37 = vld [vmem:[%s7255_s1 + $0x1d4] sm:$0xf0] }
  0x58   : > { %3865 = vmatmul.msk.bf16.gmra.mxu0 %vm357_vm1, %v282_v23  ;;  %3867 = vmatmul.msk.bf16.gmra.mxu1 %vm357_vm1, %v282_v23 }
  0x59   : > { %3869 = vmatmul.msk.bf16.gmra.mxu2 %vm357_vm1, %v282_v23  ;;  %3871 = vmatmul.msk.bf16.gmra.mxu3 %vm357_vm1, %v282_v23  ;;  %v3987_v23 = vor.u32 %v5395_v20, %v3986_v19  ;;  %v5412_v19 = vld [vmem:[%s7255_s1 + $0x1a4] sm:$0xf] }
  0x68   : > { %3912 = vmatmul.msk.bf16.vlgmr.msra.gmra.mxu0 %vm357_vm1, %v567_v58  ;;  %3914 = vmatmul.msk.bf16.vlgmr.msra.gmra.mxu1 %vm357_vm1, %v567_v58 }
  0x69   : > { %3916 = vmatmul.msk.bf16.vlgmr.msra.gmra.mxu2 %vm357_vm1, %v567_v58  ;;  %3918 = vmatmul.msk.bf16.vlgmr.msra.gmra.mxu3 %vm357_vm1, %v567_v58  ;;  %v857_v58 = vsel %vm854_vm4, %v855_v39, %v856_v40  ;;  %v5411_v39 = vld [vmem:[%s7255_s1 + $0x194] sm:$0xf0] }
  0x6a   : > { %910 = vmatpush.bf16.msra.mxu0 %v3995_v63  ;;  %928 = vmatpush.bf16.msra.mxu1 %v3999_v3  ;;  %v4036_v63 = vld [vmem:[%s7255_s1 + $0x158] sm:$0xf0] }
  0x6b   : > { %946 = vmatpush.bf16.msra.mxu2 %v4003_v4  ;;  %964 = vmatpush.bf16.msra.mxu3 %v4007_v7  ;;  %v4039_v0 = vor.u32 %v5401_v62, %v4036_v63 }
  0x6e   : > { %911 = vmatpush.bf16.msra.mxu0 %v3979_v17  ;;  %929 = vmatpush.bf16.msra.mxu1 %v3983_v22  ;;  %v4090_v17 = vld [vmem:[%s7255_s1 + $0x1a0] sm:$0xf]  ;;  %v4098_v22 = vld [vmem:[%s7255_s1 + $0x1a8] sm:$0xf] }
  0x6f   : > { %947 = vmatpush.bf16.msra.mxu2 %v3987_v23  ;;  %965 = vmatpush.bf16.msra.mxu3 %v3991_v26  ;;  %v4091_v20 = vor.u32 %v5414_v18, %v4090_v17  ;;  %v5415_v23 = vld [vmem:[%s7255_s1 + $0x1b4] sm:$0xf0]  ;;  %v5413_v26 = vld [vmem:[%s7255_s1 + $0x1ac] sm:$0xf] }
  0x70   : > { %v4099_v25 = vor.u32 %v5415_v23, %v4098_v22  ;;  %v4103_v28 = vor.u32 %v5413_v26, %v4100_v27  ;;  %v5423_v23 = vld [vmem:[%s7255_s1 + $0x1f4] sm:$0xf0]  ;;  %v5421_v26 = vld [vmem:[%s7255_s1 + $0x1ec] sm:$0xf]  ;;  %v4148_v27 = vld [vmem:[%s7255_s1 + $0x1f8] sm:$0xf0] }
  0x78   : > { %3913 = vmatmul.msk.bf16.gmra.mxu0 %vm357_vm1, %v566_v57  ;;  %3915 = vmatmul.msk.bf16.gmra.mxu1 %vm357_vm1, %v566_v57 }
  0x79   : > { %3917 = vmatmul.msk.bf16.gmra.mxu2 %vm357_vm1, %v566_v57  ;;  %3919 = vmatmul.msk.bf16.gmra.mxu3 %vm357_vm1, %v566_v57 }
  0x88   : > { %3960 = vmatmul.msk.bf16.vlgmr.msrb.gmra.mxu0 %vm357_vm1, %v714_v21  ;;  %3962 = vmatmul.msk.bf16.vlgmr.msrb.gmra.mxu1 %vm357_vm1, %v714_v21 }
  0x89   : > { %3964 = vmatmul.msk.bf16.vlgmr.msrb.gmra.mxu2 %vm357_vm1, %v714_v21  ;;  %3966 = vmatmul.msk.bf16.vlgmr.msrb.gmra.mxu3 %vm357_vm1, %v714_v21  ;;  %v4092_v21 = vld [vmem:[%s7255_s1 + $0x1b0] sm:$0xf0] }
  0x8a   : > { %1057 = vmatpush.bf16.msrb.mxu0 %v4043_v30  ;;  %1075 = vmatpush.bf16.msrb.mxu1 %v4047_v34  ;;  %v4095_v24 = vor.u32 %v5412_v19, %v4092_v21  ;;  %v5420_v21 = vld [vmem:[%s7255_s1 + $0x1e4] sm:$0xf] }
  0x8b   : > { %1093 = vmatpush.bf16.msrb.mxu2 %v4051_v35  ;;  %1111 = vmatpush.bf16.msrb.mxu3 %v4055_v38  ;;  %v4082_v38 = vld [vmem:[%s7255_s1 + $0x188] sm:$0xf] }
  0x8e   : > { %1058 = vmatpush.bf16.msrb.mxu0 %v4027_v48  ;;  %1076 = vmatpush.bf16.msrb.mxu1 %v4031_v59  ;;  %v4083_v48 = vor.u32 %v5411_v39, %v4082_v38  ;;  %v4087_v59 = vor.u32 %v5409_v49, %v4084_v51 }
  0x8f   : > { %1094 = vmatpush.bf16.msrb.mxu2 %v4035_v60  ;;  %1112 = vmatpush.bf16.msrb.mxu3 %v4039_v0 }
  0x98   : > { %3961 = vmatmul.msk.bf16.gmra.mxu0 %vm357_vm1, %v713_v13  ;;  %3963 = vmatmul.msk.bf16.gmra.mxu1 %vm357_vm1, %v713_v13 }
  0x99   : > { %3965 = vmatmul.msk.bf16.gmra.mxu2 %vm357_vm1, %v713_v13  ;;  %3967 = vmatmul.msk.bf16.gmra.mxu3 %vm357_vm1, %v713_v13  ;;  %v1001_v13 = vrot.slane %v5956_v61, 2 }
  0x9b   : > { %v1003_v30 = vor.u32 %v1002_v14, %v1001_v13 }
  0x9d   : > { %v1004_v42 = vsel %vm997_vm5, %v1000_v29, %v1003_v30  ;;  %v1145_v29 = vrot.slane %v5924_v47, 3 }
  0xa5   : > { %v6187_v55 = vpop.f32.mrf.mxu0  ;;  %v6189_v57 = vpop.f32.mrf.mxu1 }
  0xa8   : > { %4008 = vmatmul.msk.bf16.vlgmr.msra.gmra.mxu0 %vm357_vm1, %v857_v58  ;;  %4010 = vmatmul.msk.bf16.vlgmr.msra.gmra.mxu1 %vm357_vm1, %v857_v58 }
  0xa9   : > { %4012 = vmatmul.msk.bf16.vlgmr.msra.gmra.mxu2 %vm357_vm1, %v857_v58  ;;  %4014 = vmatmul.msk.bf16.vlgmr.msra.gmra.mxu3 %vm357_vm1, %v857_v58 }
  0xaa   : > { %1200 = vmatpush.bf16.msra.mxu0 %v4091_v20  ;;  %1218 = vmatpush.bf16.msra.mxu1 %v4095_v24  ;;  %v5422_v20 = vld [vmem:[%s7255_s1 + $0x1ec] sm:$0xf0] }
  0xab   : > { %1236 = vmatpush.bf16.msra.mxu2 %v4099_v25  ;;  %1254 = vmatpush.bf16.msra.mxu3 %v4103_v28  ;;  %v4151_v28 = vor.u32 %v5421_v26, %v4148_v27 }
  0xac   : > { %v6201_v1 = vpop.f32.mrf.mxu2  ;;  %v6203_v2 = vpop.f32.mrf.mxu3 }
  0xad   : > { %v6205_v3 = vpop.f32.mrf.mxu0  ;;  %v6207_v4 = vpop.f32.mrf.mxu1 }
  0xae   : > { %1201 = vmatpush.bf16.msra.mxu0 %v4075_v36  ;;  %1219 = vmatpush.bf16.msra.mxu1 %v4079_v45  ;;  %v4130_v36 = vld [vmem:[%s7255_s1 + $0x1c8] sm:$0xf]  ;;  %v5417_v45 = vld [vmem:[%s7255_s1 + $0x1cc] sm:$0xf] }
  0xaf   : > { %1237 = vmatpush.bf16.msra.mxu2 %v4083_v48  ;;  %1255 = vmatpush.bf16.msra.mxu3 %v4087_v59  ;;  %v4132_v48 = vld [vmem:[%s7255_s1 + $0x1d8] sm:$0xf0] }
  0xb0   : > { %v4135_v59 = vor.u32 %v5417_v45, %v4132_v48 }
  0xb4   : > { %v6209_v5 = vpop.f32.mrf.mxu2  ;;  %v6211_v6 = vpop.f32.mrf.mxu3 }
  0xb5   : > { %v6213_v7 = vpop.f32.mrf.mxu0  ;;  %v6215_v8 = vpop.f32.mrf.mxu1 }
  0xb8   : > { %4009 = vmatmul.msk.bf16.gmra.mxu0 %vm357_vm1, %v856_v40  ;;  %4011 = vmatmul.msk.bf16.gmra.mxu1 %vm357_vm1, %v856_v40 }
  0xb9   : > { %4013 = vmatmul.msk.bf16.gmra.mxu2 %vm357_vm1, %v856_v40  ;;  %4015 = vmatmul.msk.bf16.gmra.mxu3 %vm357_vm1, %v856_v40 }
  0xbc   : > { %v6221_v9 = vpop.f32.mrf.mxu2  ;;  %v6223_v10 = vpop.f32.mrf.mxu3 }
  0xbd   : > { %v380_v15 = vpop.f32.mrf.mxu0  ;;  %v398_v16 = vpop.f32.mrf.mxu1 }
  0xc4   : > { %v416_v34 = vpop.f32.mrf.mxu2  ;;  %v434_v35 = vpop.f32.mrf.mxu3 }
  0xc5   : > { %v490_v40 = vpop.f32.mrf.mxu0  ;;  %v508_v41 = vpop.f32.mrf.mxu1  ;;  %v4123_v35 = vor.u32 %v5418_v32, %v4122_v31  ;;  %v5424_v31 = vld [vmem:[%s7255_s1 + $0x204] sm:$0xf] }
  0xc6   : > { %v6278_v52 = vadd.f32 %v490_v40, %v6187_v55  ;;  %v6281_v58 = vadd.f32 %v508_v41, %v6189_v57 }
  0xc8   : > { %4056 = vmatmul.msk.bf16.vlgmr.msrb.gmra.mxu0 %vm357_vm1, %v1004_v42  ;;  %4058 = vmatmul.msk.bf16.vlgmr.msrb.gmra.mxu1 %vm357_vm1, %v1004_v42 }
  0xc9   : > { %4060 = vmatmul.msk.bf16.vlgmr.msrb.gmra.mxu2 %vm357_vm1, %v1004_v42  ;;  %4062 = vmatmul.msk.bf16.vlgmr.msrb.gmra.mxu3 %vm357_vm1, %v1004_v42  ;;  %v4131_v42 = vor.u32 %v5419_v37, %v4130_v36 }
  0xca   : > { %1401 = vmatpush.bf16.msrb.mxu3 %v4151_v28 }
  0xcc   : > { %v526_v60 = vpop.f32.mrf.mxu2  ;;  %v544_v62 = vpop.f32.mrf.mxu3 }
  0xcd   : > { %v6288_v55 = vadd.f32 %v526_v60, %v6201_v1  ;;  %v6291_v57 = vadd.f32 %v544_v62, %v6203_v2  ;;  %v492_v63 = vpop.f32.mrf.mxu0  ;;  %v510_v0 = vpop.f32.mrf.mxu1 }
  0xce   : > { %v6294_v11 = vadd.f32 %v492_v63, %v6205_v3  ;;  %v6297_v12 = vadd.f32 %v510_v0, %v6207_v4  ;;  %1402 = vmatpush.bf16.msrb.mxu3 %v4135_v59 }
  0xd4   : > { %v528_v13 = vpop.f32.mrf.mxu2  ;;  %v546_v14 = vpop.f32.mrf.mxu3 }
  0xd5   : > { %v6300_v15 = vadd.f32 %v528_v13, %v6209_v5  ;;  %v6303_v16 = vadd.f32 %v546_v14, %v6211_v6  ;;  %v495_v1 = vpop.f32.mrf.mxu0  ;;  %v513_v17 = vpop.f32.mrf.mxu1 }
  0xd6   : > { %v6306_v2 = vadd.f32 %v495_v1, %v6213_v7  ;;  %v6309_v18 = vadd.f32 %v513_v17, %v6215_v8  ;;  %v4138_v8 = vld [vmem:[%s7255_s1 + $0x1e0] sm:$0xf] }
  0xd7   : > { %v4139_v22 = vor.u32 %v5422_v20, %v4138_v8  ;;  %v1292_v8 = vrot.slane %v5946_v56, 4 }
  0xd8   : > { %4057 = vmatmul.msk.bf16.gmra.mxu0 %vm357_vm1, %v1003_v30  ;;  %4059 = vmatmul.msk.bf16.gmra.mxu1 %vm357_vm1, %v1003_v30 }
  0xd9   : > { %4061 = vmatmul.msk.bf16.gmra.mxu2 %vm357_vm1, %v1003_v30  ;;  %4063 = vmatmul.msk.bf16.gmra.mxu3 %vm357_vm1, %v1003_v30  ;;  %v1146_v30 = vrot.slane %v5934_v50, 3  ;;  %v4124_v50 = vld [vmem:[%s7255_s1 + $0x1d0] sm:$0xf0] }
  0xda   : > { %1347 = vmatpush.bf16.msrb.mxu0 %v4139_v22  ;;  %v4127_v41 = vor.u32 %v5416_v33, %v4124_v50  ;;  %v5427_v50 = vld [vmem:[%s7255_s1 + $0x214] sm:$0xf0] }
  0xdb   : > { %v1147_v40 = vsel %vm1144_vm6, %v1145_v29, %v1146_v30  ;;  %v4170_v29 = vld [vmem:[%s7255_s1 + $0x200] sm:$0xf] }
  0xdc   : > { %v531_v3 = vpop.f32.mrf.mxu2  ;;  %v549_v4 = vpop.f32.mrf.mxu3 }
  0xdd   : > { %v6316_v5 = vadd.f32 %v531_v3, %v6221_v9  ;;  %v6319_v6 = vadd.f32 %v549_v4, %v6223_v10  ;;  %v497_v7 = vpop.f32.mrf.mxu0  ;;  %v515_v19 = vpop.f32.mrf.mxu1  ;;  %v4140_v9 = vld [vmem:[%s7255_s1 + $0x1f0] sm:$0xf0]  ;;  %v4146_v10 = vld [vmem:[%s7255_s1 + $0x1e8] sm:$0xf] }
  0xde   : > { %v4143_v24 = vor.u32 %v5420_v21, %v4140_v9  ;;  %v4147_v25 = vor.u32 %v5423_v23, %v4146_v10  ;;  %1348 = vmatpush.bf16.msrb.mxu0 %v4123_v35  ;;  %v4186_v9 = vld [vmem:[%s7255_s1 + $0x220] sm:$0xf]  ;;  %v4178_v35 = vld [vmem:[%s7255_s1 + $0x208] sm:$0xf] }
  0xe0   : > { %1365 = vmatpush.bf16.msrb.mxu1 %v4143_v24  ;;  %1383 = vmatpush.bf16.msrb.mxu2 %v4147_v25  ;;  %v5429_v24 = vld [vmem:[%s7255_s1 + $0x22c] sm:$0xf]  ;;  %v4196_v25 = vld [vmem:[%s7255_s1 + $0x238] sm:$0xf0] }
  0xe1   : > { %v4199_v26 = vor.u32 %v5429_v24, %v4196_v25  ;;  %v1426_v24 = vpack.c.bf16 %v5921_v46, %v5921_v46 }
  0xe4   : > { %v533_v34 = vpop.f32.mrf.mxu2  ;;  %v551_v47 = vpop.f32.mrf.mxu3  ;;  %1366 = vmatpush.bf16.msrb.mxu1 %v4127_v41  ;;  %1384 = vmatpush.bf16.msrb.mxu2 %v4131_v42  ;;  %v5425_v41 = vld [vmem:[%s7255_s1 + $0x20c] sm:$0xf]  ;;  %v4180_v42 = vld [vmem:[%s7255_s1 + $0x218] sm:$0xf0] }
  0xe5   : > { %v623_v38 = vpop.f32.mrf.mxu0  ;;  %v641_v39 = vpop.f32.mrf.mxu1  ;;  %v4172_v47 = vld [vmem:[%s7255_s1 + $0x210] sm:$0xf0]  ;;  %v4183_v45 = vor.u32 %v5425_v41, %v4180_v42 }
  0xe6   : > { %v6372_v49 = vadd.f32 %v623_v38, %v6278_v52  ;;  %v6375_v51 = vadd.f32 %v641_v39, %v6281_v58  ;;  %v4175_v39 = vor.u32 %v5424_v31, %v4172_v47 }
  0xe8   : > { %4104 = vmatmul.msk.bf16.vlgmr.msra.gmra.mxu0 %vm357_vm1, %v1147_v40  ;;  %4106 = vmatmul.msk.bf16.vlgmr.msra.gmra.mxu1 %vm357_vm1, %v1147_v40 }
  0xe9   : > { %4108 = vmatmul.msk.bf16.vlgmr.msra.gmra.mxu2 %vm357_vm1, %v1147_v40  ;;  %4110 = vmatmul.msk.bf16.vlgmr.msra.gmra.mxu3 %vm357_vm1, %v1147_v40  ;;  %v4179_v40 = vor.u32 %v5427_v50, %v4178_v35 }
  0xea   : > { %1542 = vmatpush.bf16.msra.mxu3 %v4199_v26 }
  0xec   : > { %v659_v60 = vpop.f32.mrf.mxu2  ;;  %v677_v62 = vpop.f32.mrf.mxu3 }
  0xed   : > { %v6382_v52 = vadd.f32 %v659_v60, %v6288_v55  ;;  %v6385_v58 = vadd.f32 %v677_v62, %v6291_v57  ;;  %v625_v63 = vpop.f32.mrf.mxu0  ;;  %v643_v0 = vpop.f32.mrf.mxu1 }
  0xee   : > { %v6388_v13 = vadd.f32 %v625_v63, %v6294_v11  ;;  %v6391_v14 = vadd.f32 %v643_v0, %v6297_v12  ;;  %1543 = vmatpush.bf16.msra.mxu3 %v4183_v45 }
  0xf4   : > { %v661_v1 = vpop.f32.mrf.mxu2  ;;  %v679_v17 = vpop.f32.mrf.mxu3 }
  0xf5   : > { %v6394_v3 = vadd.f32 %v661_v1, %v6300_v15  ;;  %v6397_v4 = vadd.f32 %v679_v17, %v6303_v16  ;;  %v628_v55 = vpop.f32.mrf.mxu0  ;;  %v646_v7 = vpop.f32.mrf.mxu1  ;;  %v1288_v15 = vrot.slane %v5940_v53, 3  ;;  %v1289_v16 = vrot.slane %v5943_v54, 4  ;;  %v5430_v53 = vld [vmem:[%s7255_s1 + $0x22c] sm:$0xf0]  ;;  %v5428_v54 = vld [vmem:[%s7255_s1 + $0x224] sm:$0xf] }
  0xf6   : > { %v6400_v57 = vadd.f32 %v628_v55, %v6306_v2  ;;  %v6403_v19 = vadd.f32 %v646_v7, %v6309_v18  ;;  %v1291_v2 = vrot.slane %v5956_v61, 3  ;;  %v4187_v56 = vor.u32 %v5430_v53, %v4186_v9  ;;  %v4188_v61 = vld [vmem:[%s7255_s1 + $0x230] sm:$0xf0] }
  0xf7   : > { %v4191_v10 = vor.u32 %v5428_v54, %v4188_v61  ;;  %v1290_v27 = vor.u32 %v1289_v16, %v1288_v15  ;;  %v1425_v9 = vpack.c.bf16 %v5919_v44, %v5917_v43 }
  0xf8   : > { %4105 = vmatmul.msk.bf16.gmra.mxu0 %vm357_vm1, %v1146_v30  ;;  %4107 = vmatmul.msk.bf16.gmra.mxu1 %vm357_vm1, %v1146_v30  ;;  %v1293_v28 = vor.u32 %v1292_v8, %v1291_v2 }
  0xf9   : > { %4109 = vmatmul.msk.bf16.gmra.mxu2 %vm357_vm1, %v1146_v30  ;;  %4111 = vmatmul.msk.bf16.gmra.mxu3 %vm357_vm1, %v1146_v30  ;;  %v5426_v30 = vld [vmem:[%s7255_s1 + $0x20c] sm:$0xf0] }
  0xfa   : > { %1488 = vmatpush.bf16.msra.mxu0 %v4187_v56  ;;  %1506 = vmatpush.bf16.msra.mxu1 %v4191_v10  ;;  %v4171_v34 = vor.u32 %v5426_v30, %v4170_v29  ;;  %v1294_v38 = vsel %vm1287_vm7, %v1290_v27, %v1293_v28 }
  0xfc   : > { %v664_v11 = vpop.f32.mrf.mxu2  ;;  %v682_v12 = vpop.f32.mrf.mxu3 }
  0xfd   : > { %v6414_v18 = vadd.f32 %v664_v11, %v6316_v5  ;;  %v6417_v20 = vadd.f32 %v682_v12, %v6319_v6  ;;  %v630_v21 = vpop.f32.mrf.mxu0  ;;  %v648_v22 = vpop.f32.mrf.mxu1  ;;  %v4194_v5 = vld [vmem:[%s7255_s1 + $0x228] sm:$0xf]  ;;  %v5431_v6 = vld [vmem:[%s7255_s1 + $0x234] sm:$0xf0] }
  0xfe   : > { %v4195_v23 = vor.u32 %v5431_v6, %v4194_v5  ;;  %1489 = vmatpush.bf16.msra.mxu0 %v4171_v34  ;;  %1507 = vmatpush.bf16.msra.mxu1 %v4175_v39 }
 0x100   : > { %1524 = vmatpush.bf16.msra.mxu2 %v4195_v23 }
 0x104   : > { %v666_v32 = vpop.f32.mrf.mxu2  ;;  %v684_v33 = vpop.f32.mrf.mxu3  ;;  %1525 = vmatpush.bf16.msra.mxu2 %v4179_v40 }
 0x105   : > { %v770_v36 = vpop.f32.mrf.mxu0  ;;  %v788_v37 = vpop.f32.mrf.mxu1 }
 0x108   : > { %4152 = vmatmul.msk.bf16.vlgmr.msrb.gmra.mxu0 %vm357_vm1, %v1294_v38  ;;  %4154 = vmatmul.msk.bf16.vlgmr.msrb.gmra.mxu1 %vm357_vm1, %v1294_v38 }
 0x109   : > { %4156 = vmatmul.msk.bf16.vlgmr.msrb.gmra.mxu2 %vm357_vm1, %v1294_v38  ;;  %4158 = vmatmul.msk.bf16.vlgmr.msrb.gmra.mxu3 %vm357_vm1, %v1294_v38 }
 0x10c   : > { %v806_v48 = vpop.f32.mrf.mxu2  ;;  %v824_v59 = vpop.f32.mrf.mxu3 }
 0x10d   : > { %v6471_v60 = vpop.f32.mrf.mxu0  ;;  %v6473_v62 = vpop.f32.mrf.mxu1 }
 0x114   : > { %v6475_v63 = vpop.f32.mrf.mxu2  ;;  %v6477_v0 = vpop.f32.mrf.mxu3 }
 0x115   : > { %v775_v1 = vpop.f32.mrf.mxu0  ;;  %v793_v17 = vpop.f32.mrf.mxu1 }
 0x116   : > { %v841_v55 = vadd.f32 %v775_v1, %v6400_v57  ;;  %v842_v7 = vadd.f32 %v793_v17, %v6403_v19  ;;  %v833_v57 = vadd.f32 %v770_v36, %v6372_v49  ;;  %v834_v19 = vadd.f32 %v788_v37, %v6375_v51 }
 0x117   : > { %v835_v49 = vadd.f32 %v806_v48, %v6382_v52  ;;  %v836_v51 = vadd.f32 %v824_v59, %v6385_v58 }
 0x118   : > { %4153 = vmatmul.msk.bf16.gmra.mxu0 %vm357_vm1, %v1293_v28  ;;  %4155 = vmatmul.msk.bf16.gmra.mxu1 %vm357_vm1, %v1293_v28 }
 0x119   : > { %4157 = vmatmul.msk.bf16.gmra.mxu2 %vm357_vm1, %v1293_v28  ;;  %4159 = vmatmul.msk.bf16.gmra.mxu3 %vm357_vm1, %v1293_v28 }
 0x11c   : > { %v811_v11 = vpop.f32.mrf.mxu2  ;;  %v829_v12 = vpop.f32.mrf.mxu3 }
 0x11d   : > { %v843_v15 = vadd.f32 %v811_v11, %v6414_v18  ;;  %v844_v16 = vadd.f32 %v829_v12, %v6417_v20  ;;  %v777_v2 = vpop.f32.mrf.mxu0  ;;  %v795_v8 = vpop.f32.mrf.mxu1 }
 0x124   : > { %v813_v21 = vpop.f32.mrf.mxu2  ;;  %v831_v22 = vpop.f32.mrf.mxu3 }
 0x125   : > { %v913_v53 = vpop.f32.mrf.mxu0  ;;  %v931_v54 = vpop.f32.mrf.mxu1 }
 0x126   : > { %v976_v56 = vadd.f32 %v913_v53, %v833_v57  ;;  %v977_v61 = vadd.f32 %v931_v54, %v834_v19 }
 0x128   : > { %4200 = vmatmul.msk.bf16.vlgmr.msra.gmra.mxu0 %vm357_vm1, %v1425_v9  ;;  %4202 = vmatmul.msk.bf16.vlgmr.msra.gmra.mxu1 %vm357_vm1, %v1425_v9 }
 0x129   : > { %4204 = vmatmul.msk.bf16.vlgmr.msra.gmra.mxu2 %vm357_vm1, %v1425_v9  ;;  %4206 = vmatmul.msk.bf16.vlgmr.msra.gmra.mxu3 %vm357_vm1, %v1425_v9 }
 0x12c   : > { %v949_v18 = vpop.f32.mrf.mxu2  ;;  %v967_v20 = vpop.f32.mrf.mxu3 }
 0x12d   : > { %v978_v5 = vadd.f32 %v949_v18, %v835_v49  ;;  %v979_v43 = vadd.f32 %v967_v20, %v836_v51  ;;  %v6497_v44 = vpop.f32.mrf.mxu0  ;;  %v6499_v6 = vpop.f32.mrf.mxu1 }
 0x134   : > { %v6501_v10 = vpop.f32.mrf.mxu2  ;;  %v6503_v23 = vpop.f32.mrf.mxu3 }
 0x135   : > { %v918_v25 = vpop.f32.mrf.mxu0  ;;  %v936_v26 = vpop.f32.mrf.mxu1 }
 0x136   : > { %v984_v52 = vadd.f32 %v918_v25, %v841_v55  ;;  %v985_v27 = vadd.f32 %v936_v26, %v842_v7 }
 0x138   : > { %4201 = vmatmul.msk.bf16.gmra.mxu0 %vm357_vm1, %v1426_v24  ;;  %4203 = vmatmul.msk.bf16.gmra.mxu1 %vm357_vm1, %v1426_v24 }
 0x139   : > { %4205 = vmatmul.msk.bf16.gmra.mxu2 %vm357_vm1, %v1426_v24  ;;  %4207 = vmatmul.msk.bf16.gmra.mxu3 %vm357_vm1, %v1426_v24 }
 0x13c   : > { %v954_v58 = vpop.f32.mrf.mxu2  ;;  %v972_v28 = vpop.f32.mrf.mxu3 }
 0x13d   : > { %v986_v29 = vadd.f32 %v954_v58, %v843_v15  ;;  %v987_v30 = vadd.f32 %v972_v28, %v844_v16  ;;  %v920_v31 = vpop.f32.mrf.mxu0  ;;  %v938_v32 = vpop.f32.mrf.mxu1 }
 0x144   : > { %v956_v33 = vpop.f32.mrf.mxu2  ;;  %v974_v46 = vpop.f32.mrf.mxu3 }
 0x145   : > { %v1060_v34 = vpop.f32.mrf.mxu0  ;;  %v1078_v47 = vpop.f32.mrf.mxu1 }
 0x146   : > { %v1123_v35 = vadd.f32 %v1060_v34, %v976_v56  ;;  %v1124_v50 = vadd.f32 %v1078_v47, %v977_v61 }
 0x14c   : > { %v1096_v36 = vpop.f32.mrf.mxu2  ;;  %v1114_v37 = vpop.f32.mrf.mxu3 }
 0x14d   : > { %v1125_v38 = vadd.f32 %v1096_v36, %v978_v5  ;;  %v1126_v39 = vadd.f32 %v1114_v37, %v979_v43  ;;  %v6511_v40 = vpop.f32.mrf.mxu0  ;;  %v6513_v41 = vpop.f32.mrf.mxu1 }
 0x154   : > { %v6515_v42 = vpop.f32.mrf.mxu2  ;;  %v6517_v45 = vpop.f32.mrf.mxu3 }
 0x155   : > { %v1065_v48 = vpop.f32.mrf.mxu0  ;;  %v1083_v59 = vpop.f32.mrf.mxu1 }
 0x156   : > { %v1131_v1 = vadd.f32 %v1065_v48, %v984_v52  ;;  %v1132_v17 = vadd.f32 %v1083_v59, %v985_v27 }
 0x15c   : > { %v1101_v55 = vpop.f32.mrf.mxu2  ;;  %v1119_v7 = vpop.f32.mrf.mxu3 }
 0x15d   : > { %v6519_v11 = vadd.f32 %v1101_v55, %v986_v29  ;;  %v6521_v12 = vadd.f32 %v1119_v7, %v987_v30  ;;  %v1067_v15 = vpop.f32.mrf.mxu0  ;;  %v1085_v16 = vpop.f32.mrf.mxu1  ;;  %v837_v55 = vadd.f32 %v6471_v60, %v6388_v13  ;;  %v838_v7 = vadd.f32 %v6473_v62, %v6391_v14 }
 0x15e   : > { %v839_v15 = vadd.f32 %v6475_v63, %v6394_v3  ;;  %v840_v16 = vadd.f32 %v6477_v0, %v6397_v4 }
 0x160   : > { %v983_v13 = vadd.f32 %v6503_v23, %v840_v16  ;;  %v1572_v23 = vlaneseq }
 0x164   : > { %v1103_v2 = vpop.f32.mrf.mxu2  ;;  %v1121_v8 = vpop.f32.mrf.mxu3 }
 0x165   : > { %v1203_v57 = vpop.f32.mrf.mxu0  ;;  %v1221_v19 = vpop.f32.mrf.mxu1 }
 0x166   : > { %v1266_v21 = vadd.f32 %v1203_v57, %v1123_v35  ;;  %v1267_v22 = vadd.f32 %v1221_v19, %v1124_v50 }
 0x16c   : > { %v1239_v9 = vpop.f32.mrf.mxu2  ;;  %v1257_v53 = vpop.f32.mrf.mxu3 }
 0x16d   : > { %v1268_v54 = vadd.f32 %v1239_v9, %v1125_v38  ;;  %v1269_v56 = vadd.f32 %v1257_v53, %v1126_v39  ;;  %v1205_v61 = vpop.f32.mrf.mxu0  ;;  %v1223_v49 = vpop.f32.mrf.mxu1  ;;  %v980_v9 = vadd.f32 %v6497_v44, %v837_v55  ;;  %v981_v53 = vadd.f32 %v6499_v6, %v838_v7 }
 0x16e   : > { %v1130_v6 = vadd.f32 %v6517_v45, %v983_v13  ;;  %v1576_v7 = vand.u32 127, %v1572_v23  ;;  %v5455_v13 = vld [vmem:[%s7257_s3 + $0xb8] sm:$0xff] }
 0x16f   : > { %v1127_v0 = vadd.f32 %v6511_v40, %v980_v9 }
 0x174   : > { %v1241_v51 = vpop.f32.mrf.mxu2  ;;  %v1259_v18 = vpop.f32.mrf.mxu3 }
 0x175   : > { %v1208_v20 = vpop.f32.mrf.mxu0  ;;  %v1226_v5 = vpop.f32.mrf.mxu1 }
 0x176   : > { %v6523_v43 = vadd.f32 %v1208_v20, %v1131_v1  ;;  %v6525_v24 = vadd.f32 %v1226_v5, %v1132_v17  ;;  %v982_v20 = vadd.f32 %v6501_v10, %v839_v15 }
 0x178   : > { %v1129_v44 = vadd.f32 %v6515_v42, %v982_v20 }
 0x17c   : > { %v6527_v25 = vpop.f32.mrf.mxu2  ;;  %v6529_v26 = vpop.f32.mrf.mxu3 }
 0x17d   : > { %v1210_v52 = vpop.f32.mrf.mxu0  ;;  %v1228_v27 = vpop.f32.mrf.mxu1 }
 0x17e   : > { %v1272_v27 = vadd.f32 %v1241_v51, %v1129_v44  ;;  %v5461_v44 = vld [vmem:[%s7257_s3 + $0xe8] sm:$0xff] }
 0x184   : > { %v1246_v58 = vpop.f32.mrf.mxu2  ;;  %v1264_v28 = vpop.f32.mrf.mxu3 }
 0x185   : > { %v1350_v29 = vpop.f32.mrf.mxu0  ;;  %v1368_v30 = vpop.f32.mrf.mxu1  ;;  %v1273_v58 = vadd.f32 %v1259_v18, %v1130_v6  ;;  %v5436_v6 = vld [vmem:[%s7257_s3 + $0x20] sm:$0xff] }
 0x186   : > { %v1413_v2 = vadd.f32 %v1350_v29, %v1266_v21  ;;  %v1414_v8 = vadd.f32 %v1368_v30, %v1267_v22  ;;  %v1128_v21 = vadd.f32 %v6513_v41, %v981_v53  ;;  %v1573_v41 = vshrl.u32 %v1572_v23, 7  ;;  %v5460_v23 = vld [vmem:[%s7257_s3 + $0xe0] sm:$0xff] }
 0x188   : > { %v1577_v55 = vmul.u32 2, %v1573_v41  ;;  %v1574_v16 = vadd.s32 8, %v1573_v41  ;;  %v5449_v41 = vld [vmem:[%s7257_s3 + $0x88] sm:$0xff] }
 0x18a   : > { %v1585_v15 = vadd.s32 1, %v1577_v55  ;;  %vm1579_vm9 = vcmp.eq.s32.totalorder %v1576_v7, %v1577_v55  ;;  %v5495_v55 = vld [vmem:[%s7257_s3 + $0x1f8] sm:$0xff] }
 0x18c   : > { %v1386_v31 = vpop.f32.mrf.mxu2  ;;  %v1404_v32 = vpop.f32.mrf.mxu3  ;;  %vm1587_vm8 = vcmp.eq.s32.totalorder %v1576_v7, %v1585_v15  ;;  %v5476_v15 = vld [vmem:[%s7257_s3 + $0x160] sm:$0xff] }
 0x18d   : > { %v1352_v33 = vpop.f32.mrf.mxu0  ;;  %v1370_v46 = vpop.f32.mrf.mxu1  ;;  %v1415_v57 = vadd.f32 %v1386_v31, %v1268_v54  ;;  %v1416_v19 = vadd.f32 %v1404_v32, %v1269_v56  ;;  %v1270_v54 = vadd.f32 %v1205_v61, %v1127_v0  ;;  %v1271_v56 = vadd.f32 %v1223_v49, %v1128_v21  ;;  %v5453_v21 = vld [vmem:[%s7257_s3 + $0xa8] sm:$0xff] }
 0x18e   : > { %v1276_v61 = vadd.f32 %v6527_v25, %v6519_v11  ;;  %v1277_v49 = vadd.f32 %v6529_v26, %v6521_v12  ;;  %v1578_v12 = vmul.u32 2, %v1574_v16  ;;  %v5736_v26 = vmov 0.0   ;;  %v5484_v16 = vld [vmem:[%s7257_s3 + $0x1a0] sm:$0xff] }
 0x18f   : > { %v1417_v28 = vadd.f32 %v1352_v33, %v1270_v54  ;;  %v1418_v29 = vadd.f32 %v1370_v46, %v1271_v56  ;;  %v5435_v54 = vld [vmem:[%s7257_s3 + $0x18] sm:$0xff] }
 0x190   : > { %v1586_v20 = vadd.s32 1, %v1578_v12  ;;  %vm1580_vm12 = vcmp.eq.s32.totalorder %v1576_v7, %v1578_v12  ;;  %v5443_v56 = vld [vmem:[%s7257_s3 + $0x58] sm:$0xff]  ;;  %v5490_v12 = vld [vmem:[%s7257_s3 + $0x1d0] sm:$0xff] }
 0x191   : > { %v4209_v0 = vsel %vm1580_vm12, 1.0, %v5736_v26 }
 0x192   : > { %vm1588_vm11 = vcmp.eq.s32.totalorder %v1576_v7, %v1586_v20  ;;  %v5468_v7 = vld [vmem:[%s7257_s3 + $0x120] sm:$0xff] }
 0x193   : > { %v5488_v20 = vld [vmem:[%s7257_s3 + $0x1c0] sm:$0xff] }
 0x194   : > { %v1388_v34 = vpop.f32.mrf.mxu2  ;;  %v1406_v47 = vpop.f32.mrf.mxu3 }
 0x195   : > { %v1355_v35 = vpop.f32.mrf.mxu0  ;;  %v1373_v50 = vpop.f32.mrf.mxu1  ;;  %v1419_v30 = vadd.f32 %v1388_v34, %v1272_v27  ;;  %v1420_v31 = vadd.f32 %v1406_v47, %v1273_v58  ;;  %v5451_v27 = vld [vmem:[%s7257_s3 + $0x98] sm:$0xff] }
 0x196   : > { %v1421_v51 = vadd.f32 %v1355_v35, %v6523_v43  ;;  %v1422_v18 = vadd.f32 %v1373_v50, %v6525_v24  ;;  %v4210_v35 = vsel %vm1587_vm8, 1.0, %v5736_v26  ;;  %v4208_v50 = vsel %vm1579_vm9, 1.0, %v5736_v26  ;;  %v5459_v58 = vld [vmem:[%s7257_s3 + $0xd8] sm:$0xff] }
 0x19c   : > { %v1391_v36 = vpop.f32.mrf.mxu2  ;;  %v1409_v37 = vpop.f32.mrf.mxu3 }
 0x19d   : > { %v1357_v38 = vpop.f32.mrf.mxu0  ;;  %v1375_v39 = vpop.f32.mrf.mxu1  ;;  %v1423_v33 = vadd.f32 %v1391_v36, %v1276_v61  ;;  %v1424_v46 = vadd.f32 %v1409_v37, %v1277_v49  ;;  %v5439_v36 = vld [vmem:[%s7257_s3 + $0x38] sm:$0xff]  ;;  %v5470_v61 = vld [vmem:[%s7257_s3 + $0x130] sm:$0xff] }
 0x19e   : > { %v5447_v37 = vld [vmem:[%s7257_s3 + $0x78] sm:$0xff]  ;;  %v5478_v49 = vld [vmem:[%s7257_s3 + $0x170] sm:$0xff] }
 0x1a4   : > { %v1393_v48 = vpop.f32.mrf.mxu2  ;;  %v1411_v59 = vpop.f32.mrf.mxu3 }
 0x1a5   : > { %v1491_v1 = vpop.f32.mrf.mxu0  ;;  %v1509_v17 = vpop.f32.mrf.mxu1 }
 0x1a6   : > { %v1554_v62 = vadd.f32 %v1491_v1, %v1413_v2  ;;  %v1555_v5 = vadd.f32 %v1509_v17, %v1414_v8 }
 0x1ac   : > { %v1527_v60 = vpop.f32.mrf.mxu2  ;;  %v1545_v14 = vpop.f32.mrf.mxu3 }
 0x1ad   : > { %v1556_v3 = vadd.f32 %v1527_v60, %v1415_v57  ;;  %v1557_v63 = vadd.f32 %v1545_v14, %v1416_v19  ;;  %v1493_v52 = vpop.f32.mrf.mxu0  ;;  %v1511_v4 = vpop.f32.mrf.mxu1  ;;  %v5463_v60 = vld [vmem:[%s7257_s3 + $0xf8] sm:$0xff]  ;;  %v5438_v14 = vld [vmem:[%s7257_s3 + $0x30] sm:$0xff] }
 0x1ae   : > { %v1558_v38 = vadd.f32 %v1493_v52, %v1417_v28  ;;  %v1559_v42 = vadd.f32 %v1511_v4, %v1418_v29  ;;  %v5437_v52 = vld [vmem:[%s7257_s3 + $0x28] sm:$0xff]  ;;  %v5434_v28 = vld [vmem:[%s7257_s3 + $0x10] sm:$0xff] }
 0x1af   : > { %v6547_v22 = vmax.f32 %v1554_v62, %v1556_v3  ;;  %v6549_v10 = vmax.f32 %v1555_v5, %v1557_v63  ;;  %v5446_v62 = vld [vmem:[%s7257_s3 + $0x70] sm:$0xff]  ;;  %v4211_v63 = vsel %vm1588_vm11, 1.0, %v5736_v26  ;;  %v5445_v4 = vld [vmem:[%s7257_s3 + $0x68] sm:$0xff] }
 0x1b0   : > { %v5454_v5 = vld [vmem:[%s7257_s3 + $0xb0] sm:$0xff]  ;;  %v5481_v26 = vld [vmem:[%s7257_s3 + $0x188] sm:$0xff] }
 0x1b1   : > { %v5462_v3 = vld [vmem:[%s7257_s3 + $0xf0] sm:$0xff] }
 0x1b2   : > { %v5442_v29 = vld [vmem:[%s7257_s3 + $0x50] sm:$0xff] }
 0x1b4   : > { %v1529_v40 = vpop.f32.mrf.mxu2  ;;  %v1547_v32 = vpop.f32.mrf.mxu3 }
 0x1b5   : > { %v1560_v39 = vadd.f32 %v1529_v40, %v1419_v30  ;;  %v1561_v45 = vadd.f32 %v1547_v32, %v1420_v31  ;;  %v1496_v48 = vpop.f32.mrf.mxu0  ;;  %v1514_v59 = vpop.f32.mrf.mxu1  ;;  %v5450_v30 = vld [vmem:[%s7257_s3 + $0x90] sm:$0xff]  ;;  %v5433_v40 = vld [vmem:[%s7257_s3 + $0x8] sm:$0xff] }
 0x1b6   : > { %v1562_v2 = vadd.f32 %v1496_v48, %v1421_v51  ;;  %v1563_v8 = vadd.f32 %v1514_v59, %v1422_v18  ;;  %v5458_v31 = vld [vmem:[%s7257_s3 + $0xd0] sm:$0xff]  ;;  %v5441_v32 = vld [vmem:[%s7257_s3 + $0x48] sm:$0xff]  ;;  %v5479_v48 = vld [vmem:[%s7257_s3 + $0x178] sm:$0xff] }
 0x1b7   : > { %v1568_v1 = vmax.f32 %v1558_v38, %v1560_v39  ;;  %v1569_v17 = vmax.f32 %v1559_v42, %v1561_v45  ;;  %v5457_v38 = vld [vmem:[%s7257_s3 + $0xc8] sm:$0xff]  ;;  %v5432_v42 = vld [vmem:[%s7257_s3] sm:$0xff]  ;;  %v5471_v45 = vld [vmem:[%s7257_s3 + $0x138] sm:$0xff] }
 0x1b8   : > { %v5440_v39 = vld [vmem:[%s7257_s3 + $0x40] sm:$0xff]  ;;  %v5486_v51 = vld [vmem:[%s7257_s3 + $0x1b0] sm:$0xff] }
 0x1b9   : > { %v5448_v59 = vld [vmem:[%s7257_s3 + $0x80] sm:$0xff]  ;;  %v5494_v18 = vld [vmem:[%s7257_s3 + $0x1f0] sm:$0xff] }
 0x1bc   : > { %v1532_v34 = vpop.f32.mrf.mxu2  ;;  %v1550_v47 = vpop.f32.mrf.mxu3 }
 0x1bd   : > { %v1564_v57 = vadd.f32 %v1532_v34, %v1423_v33  ;;  %v1565_v19 = vadd.f32 %v1550_v47, %v1424_v46  ;;  %v1498_v9 = vpop.f32.mrf.mxu0  ;;  %v1516_v11 = vpop.f32.mrf.mxu1  ;;  %v5469_v33 = vld [vmem:[%s7257_s3 + $0x128] sm:$0xff] }
 0x1be   : > { %v5477_v46 = vld [vmem:[%s7257_s3 + $0x168] sm:$0xff]  ;;  %v5491_v9 = vld [vmem:[%s7257_s3 + $0x1d8] sm:$0xff]  ;;  %v5466_v11 = vld [vmem:[%s7257_s3 + $0x110] sm:$0xff] }
 0x1bf   : > { %v1570_v25 = vmax.f32 %v1562_v2, %v1564_v57  ;;  %v1571_v53 = vmax.f32 %v1563_v8, %v1565_v19  ;;  %v5485_v34 = vld [vmem:[%s7257_s3 + $0x1a8] sm:$0xff]  ;;  %v5492_v2 = vld [vmem:[%s7257_s3 + $0x1e0] sm:$0xff]  ;;  %v5467_v8 = vld [vmem:[%s7257_s3 + $0x118] sm:$0xff] }
 0x1c0   : > { %v5493_v47 = vld [vmem:[%s7257_s3 + $0x1e8] sm:$0xff]  ;;  %v5475_v57 = vld [vmem:[%s7257_s3 + $0x158] sm:$0xff] }
 0x1c1   : > { %1613 = vmatpush.msrb.mxu0 %v1570_v25  ;;  %1636 = vmatpush.msrb.mxu1 %v1571_v53  ;;  %v5483_v19 = vld [vmem:[%s7257_s3 + $0x198] sm:$0xff] }
 0x1c2   : > { %1665 = vmatpush.msrb.mxu2 %v1570_v25  ;;  %1688 = vmatpush.msrb.mxu3 %v1571_v53  ;;  %v5474_v25 = vld [vmem:[%s7257_s3 + $0x150] sm:$0xff] }
 0x1c3   : > { %1614 = vmatpush.msrb.mxu0 %v1568_v1  ;;  %1637 = vmatpush.msrb.mxu1 %v1569_v17  ;;  %v5482_v53 = vld [vmem:[%s7257_s3 + $0x190] sm:$0xff] }
 0x1c4   : > { %1666 = vmatpush.msrb.mxu2 %v1568_v1  ;;  %1689 = vmatpush.msrb.mxu3 %v1569_v17  ;;  %v1534_v43 = vpop.f32.mrf.mxu2  ;;  %v1552_v24 = vpop.f32.mrf.mxu3  ;;  %v5456_v1 = vld [vmem:[%s7257_s3 + $0xc0] sm:$0xff]  ;;  %v5487_v17 = vld [vmem:[%s7257_s3 + $0x1b8] sm:$0xff] }
 0x1c5   : > { %1615 = vmatpush.msrb.mxu0 %v6547_v22  ;;  %1638 = vmatpush.msrb.mxu1 %v6549_v10  ;;  %v5465_v43 = vld [vmem:[%s7257_s3 + $0x108] sm:$0xff] }
 0x1c6   : > { %1667 = vmatpush.msrb.mxu2 %v6547_v22  ;;  %1690 = vmatpush.msrb.mxu3 %v6549_v10  ;;  %v5444_v22 = vld [vmem:[%s7257_s3 + $0x60] sm:$0xff]  ;;  %v5473_v24 = vld [vmem:[%s7257_s3 + $0x148] sm:$0xff] }
 0x1c7   : > { %4216 = vmatmul.msk.f32.vlgmr.msrb.gmra.mxu2 %vm1593_vm10, %v4210_v35  ;;  %4218 = vmatmul.msk.f32.vlgmr.msrb.gmra.mxu3 %vm1593_vm10, %v4210_v35  ;;  %v5452_v10 = vld [vmem:[%s7257_s3 + $0xa0] sm:$0xff]  ;;  %v5489_v35 = vld [vmem:[%s7257_s3 + $0x1c8] sm:$0xff] }
 0x1c8   : > { %4212 = vmatmul.msk.f32.vlgmr.msrb.gmra.mxu0 %vm1593_vm10, %v4208_v50  ;;  %4214 = vmatmul.msk.f32.vlgmr.msrb.gmra.mxu1 %vm1593_vm10, %v4208_v50  ;;  %v5464_v50 = vld [vmem:[%s7257_s3 + $0x100] sm:$0xff] }
 0x1c9   : > { %1847 = vmatpush.bf16.msra.mxu0 %v5439_v36  ;;  %1860 = vmatpush.bf16.msra.mxu1 %v5447_v37  ;;  %v5472_v36 = vld [vmem:[%s7257_s3 + $0x140] sm:$0xff] }
 0x1ca   : > { %2011 = vmatpush.bf16.msra.mxu2 %v5455_v13  ;;  %2024 = vmatpush.bf16.msra.mxu3 %v5463_v60  ;;  %v5480_v37 = vld [vmem:[%s7257_s3 + $0x180] sm:$0xff] }
 0x1cb   : > { %v6764_v13 = vld [vmem:[%s7256_s2] sm:$0x3] }
 0x1cd   : > { %1848 = vmatpush.bf16.msra.mxu0 %v5438_v14  ;;  %1861 = vmatpush.bf16.msra.mxu1 %v5446_v62  ;;  %v1704_v62 = vperm.slane %v6764_v13, 0 }
 0x1ce   : > { %2012 = vmatpush.bf16.msra.mxu2 %v5454_v5  ;;  %2025 = vmatpush.bf16.msra.mxu3 %v5462_v3  ;;  %v1705_v5 = vperm.slane %v6764_v13, 1  ;;  %v5569_v13 = vld [vmem:[%s7257_s3 + $0x448] sm:$0xff] }
 0x1cf   : > { %4217 = vmatmul.msk.f32.gmra.mxu2 %vm1593_vm10, %v4211_v63  ;;  %4219 = vmatmul.msk.f32.gmra.mxu3 %vm1593_vm10, %v4211_v63 }
 0x1d0   : > { %4213 = vmatmul.msk.f32.gmra.mxu0 %vm1593_vm10, %v4209_v0  ;;  %4215 = vmatmul.msk.f32.gmra.mxu1 %vm1593_vm10, %v4209_v0 }
 0x1d1   : > { %1849 = vmatpush.bf16.msra.mxu0 %v5437_v52  ;;  %1862 = vmatpush.bf16.msra.mxu1 %v5445_v4 }
 0x1d2   : > { %2013 = vmatpush.bf16.msra.mxu2 %v5453_v21  ;;  %2026 = vmatpush.bf16.msra.mxu3 %v5461_v44 }
 0x1d5   : > { %1850 = vmatpush.bf16.msra.mxu0 %v5436_v6  ;;  %1863 = vmatpush.bf16.msra.mxu1 %v5444_v22  ;;  %v5503_v22 = vld [vmem:[%s7257_s3 + $0x238] sm:$0xff] }
 0x1d6   : > { %2014 = vmatpush.bf16.msra.mxu2 %v5452_v10  ;;  %2027 = vmatpush.bf16.msra.mxu3 %v5460_v23  ;;  %v5511_v10 = vld [vmem:[%s7257_s3 + $0x278] sm:$0xff] }
 0x1d9   : > { %1851 = vmatpush.bf16.msra.mxu0 %v5435_v54  ;;  %1864 = vmatpush.bf16.msra.mxu1 %v5443_v56  ;;  %v5519_v56 = vld [vmem:[%s7257_s3 + $0x2b8] sm:$0xff] }
 0x1da   : > { %2015 = vmatpush.bf16.msra.mxu2 %v5451_v27  ;;  %2028 = vmatpush.bf16.msra.mxu3 %v5459_v58  ;;  %v5527_v27 = vld [vmem:[%s7257_s3 + $0x2f8] sm:$0xff] }
 0x1dd   : > { %1852 = vmatpush.bf16.msra.mxu0 %v5434_v28  ;;  %1865 = vmatpush.bf16.msra.mxu1 %v5442_v29  ;;  %v5502_v29 = vld [vmem:[%s7257_s3 + $0x230] sm:$0xff] }
 0x1de   : > { %2016 = vmatpush.bf16.msra.mxu2 %v5450_v30  ;;  %2029 = vmatpush.bf16.msra.mxu3 %v5458_v31  ;;  %v5510_v30 = vld [vmem:[%s7257_s3 + $0x270] sm:$0xff] }
 0x1df   : > { %v5518_v31 = vld [vmem:[%s7257_s3 + $0x2b0] sm:$0xff] }
 0x1e1   : > { %1853 = vmatpush.bf16.msra.mxu0 %v5433_v40  ;;  %1866 = vmatpush.bf16.msra.mxu1 %v5441_v32  ;;  %v5526_v40 = vld [vmem:[%s7257_s3 + $0x2f0] sm:$0xff]  ;;  %v5501_v32 = vld [vmem:[%s7257_s3 + $0x228] sm:$0xff] }
 0x1e2   : > { %2017 = vmatpush.bf16.msra.mxu2 %v5449_v41  ;;  %2030 = vmatpush.bf16.msra.mxu3 %v5457_v38  ;;  %v5509_v41 = vld [vmem:[%s7257_s3 + $0x268] sm:$0xff] }
 0x1e3   : > { %v5517_v38 = vld [vmem:[%s7257_s3 + $0x2a8] sm:$0xff] }
 0x1e5   : > { %1854 = vmatpush.bf16.msra.mxu0 %v5432_v42  ;;  %1867 = vmatpush.bf16.msra.mxu1 %v5440_v39  ;;  %v5525_v42 = vld [vmem:[%s7257_s3 + $0x2e8] sm:$0xff]  ;;  %v5500_v39 = vld [vmem:[%s7257_s3 + $0x220] sm:$0xff] }
 0x1e6   : > { %2018 = vmatpush.bf16.msra.mxu2 %v5448_v59  ;;  %2031 = vmatpush.bf16.msra.mxu3 %v5456_v1  ;;  %v5524_v59 = vld [vmem:[%s7257_s3 + $0x2e0] sm:$0xff]  ;;  %v5499_v1 = vld [vmem:[%s7257_s3 + $0x218] sm:$0xff] }
 0x1e9   : > { %2173 = vmatpush.bf16.msrb.mxu0 %v5471_v45  ;;  %2186 = vmatpush.bf16.msrb.mxu1 %v5479_v48  ;;  %v5508_v45 = vld [vmem:[%s7257_s3 + $0x260] sm:$0xff] }
 0x1ea   : > { %2333 = vmatpush.bf16.msrb.mxu2 %v5487_v17  ;;  %2346 = vmatpush.bf16.msrb.mxu3 %v5495_v55  ;;  %v5516_v48 = vld [vmem:[%s7257_s3 + $0x2a0] sm:$0xff]  ;;  %v5507_v17 = vld [vmem:[%s7257_s3 + $0x258] sm:$0xff] }
 0x1ed   : > { %2174 = vmatpush.bf16.msrb.mxu0 %v5470_v61  ;;  %2187 = vmatpush.bf16.msrb.mxu1 %v5478_v49  ;;  %v5515_v49 = vld [vmem:[%s7257_s3 + $0x298] sm:$0xff] }
 0x1ee   : > { %2334 = vmatpush.bf16.msrb.mxu2 %v5486_v51  ;;  %2347 = vmatpush.bf16.msrb.mxu3 %v5494_v18  ;;  %v5523_v51 = vld [vmem:[%s7257_s3 + $0x2d8] sm:$0xff] }
 0x1f1   : > { %2175 = vmatpush.bf16.msrb.mxu0 %v5469_v33  ;;  %2188 = vmatpush.bf16.msrb.mxu1 %v5477_v46  ;;  %v5498_v46 = vld [vmem:[%s7257_s3 + $0x210] sm:$0xff] }
 0x1f2   : > { %2335 = vmatpush.bf16.msrb.mxu2 %v5485_v34  ;;  %2348 = vmatpush.bf16.msrb.mxu3 %v5493_v47  ;;  %v5506_v34 = vld [vmem:[%s7257_s3 + $0x250] sm:$0xff] }
 0x1f3   : > { %v5514_v47 = vld [vmem:[%s7257_s3 + $0x290] sm:$0xff] }
 0x1f5   : > { %2176 = vmatpush.bf16.msrb.mxu0 %v5468_v7  ;;  %2189 = vmatpush.bf16.msrb.mxu1 %v5476_v15  ;;  %v5522_v7 = vld [vmem:[%s7257_s3 + $0x2d0] sm:$0xff]  ;;  %v5497_v15 = vld [vmem:[%s7257_s3 + $0x208] sm:$0xff] }
 0x1f6   : > { %2336 = vmatpush.bf16.msrb.mxu2 %v5484_v16  ;;  %2349 = vmatpush.bf16.msrb.mxu3 %v5492_v2  ;;  %v5505_v16 = vld [vmem:[%s7257_s3 + $0x248] sm:$0xff] }
 0x1f7   : > { %v5513_v2 = vld [vmem:[%s7257_s3 + $0x288] sm:$0xff] }
 0x1f9   : > { %2177 = vmatpush.bf16.msrb.mxu0 %v5467_v8  ;;  %2190 = vmatpush.bf16.msrb.mxu1 %v5475_v57  ;;  %v5521_v8 = vld [vmem:[%s7257_s3 + $0x2c8] sm:$0xff]  ;;  %v5496_v57 = vld [vmem:[%s7257_s3 + $0x200] sm:$0xff] }
 0x1fa   : > { %2337 = vmatpush.bf16.msrb.mxu2 %v5483_v19  ;;  %2350 = vmatpush.bf16.msrb.mxu3 %v5491_v9  ;;  %v5504_v19 = vld [vmem:[%s7257_s3 + $0x240] sm:$0xff]  ;;  %v5535_v9 = vld [vmem:[%s7257_s3 + $0x338] sm:$0xff] }
 0x1fd   : > { %2178 = vmatpush.bf16.msrb.mxu0 %v5466_v11  ;;  %2191 = vmatpush.bf16.msrb.mxu1 %v5474_v25  ;;  %v5543_v11 = vld [vmem:[%s7257_s3 + $0x378] sm:$0xff]  ;;  %v5512_v25 = vld [vmem:[%s7257_s3 + $0x280] sm:$0xff] }
 0x1fe   : > { %2338 = vmatpush.bf16.msrb.mxu2 %v5482_v53  ;;  %2351 = vmatpush.bf16.msrb.mxu3 %v5490_v12  ;;  %v5520_v53 = vld [vmem:[%s7257_s3 + $0x2c0] sm:$0xff]  ;;  %v5551_v12 = vld [vmem:[%s7257_s3 + $0x3b8] sm:$0xff] }
 0x201   : > { %2179 = vmatpush.bf16.msrb.mxu0 %v5465_v43  ;;  %2192 = vmatpush.bf16.msrb.mxu1 %v5473_v24  ;;  %v5559_v43 = vld [vmem:[%s7257_s3 + $0x3f8] sm:$0xff]  ;;  %v5534_v24 = vld [vmem:[%s7257_s3 + $0x330] sm:$0xff] }
 0x202   : > { %2339 = vmatpush.bf16.msrb.mxu2 %v5481_v26  ;;  %2352 = vmatpush.bf16.msrb.mxu3 %v5489_v35  ;;  %v5542_v26 = vld [vmem:[%s7257_s3 + $0x370] sm:$0xff] }
 0x205   : > { %2180 = vmatpush.bf16.msrb.mxu0 %v5464_v50  ;;  %2193 = vmatpush.bf16.msrb.mxu1 %v5472_v36  ;;  %v5550_v36 = vld [vmem:[%s7257_s3 + $0x3b0] sm:$0xff] }
 0x206   : > { %2340 = vmatpush.bf16.msrb.mxu2 %v5480_v37  ;;  %2353 = vmatpush.bf16.msrb.mxu3 %v5488_v20  ;;  %v5558_v37 = vld [vmem:[%s7257_s3 + $0x3f0] sm:$0xff] }
 0x245   : > { %v1617_v60 = vpop.f32.mrf.mxu0  ;;  %v1640_v14 = vpop.f32.mrf.mxu1 }
 0x24a   : > { %v1669_v3 = vpop.f32.mrf.mxu2  ;;  %v1692_v63 = vpop.f32.mrf.mxu3 }
 0x24b   : > { %v1698_v52 = vmax.f32 %v1617_v60, %v1669_v3  ;;  %v1699_v4 = vmax.f32 %v1640_v14, %v1692_v63  ;;  %v5533_v14 = vld [vmem:[%s7257_s3 + $0x328] sm:$0xff] }
 0x24c   : > { %v5541_v3 = vld [vmem:[%s7257_s3 + $0x368] sm:$0xff] }
 0x24d   : > { %v1708_v0 = vadd.f32 %v1704_v62, %v1698_v52  ;;  %v1709_v21 = vadd.f32 %v1705_v5, %v1699_v4  ;;  %v5549_v63 = vld [vmem:[%s7257_s3 + $0x3a8] sm:$0xff]  ;;  %v5532_v4 = vld [vmem:[%s7257_s3 + $0x320] sm:$0xff] }
 0x24e   : > { %v5557_v52 = vld [vmem:[%s7257_s3 + $0x3e8] sm:$0xff] }
 0x24f   : > { %v1712_v44 = vmax.f32 %v1708_v0, 0.0  ;;  %v1713_v6 = vmax.f32 %v1709_v21, 0.0  ;;  %v5540_v0 = vld [vmem:[%s7257_s3 + $0x360] sm:$0xff] }
 0x250   : > { %v5548_v21 = vld [vmem:[%s7257_s3 + $0x3a0] sm:$0xff] }
 0x251   : > { %v6778_v23 = vpack.c.bf16 %v1712_v44, %v1712_v44  ;;  %v6780_v54 = vpack.c.bf16 %v1713_v6, %v1713_v6  ;;  %v5556_v44 = vld [vmem:[%s7257_s3 + $0x3e0] sm:$0xff]  ;;  %v5531_v6 = vld [vmem:[%s7257_s3 + $0x318] sm:$0xff] }
 0x253   : > { %1855 = vmatmul.bf16.vlgmr.msra.gmra.mxu0 %v6778_v23  ;;  %1868 = vmatmul.bf16.vlgmr.msra.gmra.mxu1 %v6780_v54  ;;  %v6791_v58 = vshrl.u32 %v6778_v23, 16  ;;  %v6794_v28 = vshrl.u32 %v6780_v54, 16  ;;  %v2073_v55 = vrot.slane %v6778_v23, 1  ;;  %v2074_v61 = vrot.slane %v6780_v54, 1 }
 0x254   : > { %2493 = vmatpush.bf16.msra.mxu0 %v5503_v22  ;;  %2506 = vmatpush.bf16.msra.mxu1 %v5511_v10  ;;  %v2393_v35 = vrot.slane %v6778_v23, 2  ;;  %v2394_v50 = vrot.slane %v6780_v54, 2  ;;  %v5539_v22 = vld [vmem:[%s7257_s3 + $0x358] sm:$0xff] }
 0x255   : > { %2019 = vmatmul.bf16.vlgmr.msra.gmra.mxu2 %v6791_v58  ;;  %2032 = vmatmul.bf16.vlgmr.msra.gmra.mxu3 %v6794_v28  ;;  %v2233_v18 = vrot.slane %v6791_v58, 1  ;;  %v2234_v33 = vrot.slane %v6794_v28, 1  ;;  %v2553_v20 = vrot.slane %v6791_v58, 2  ;;  %v2554_v60 = vrot.slane %v6794_v28, 2  ;;  %v5547_v10 = vld [vmem:[%s7257_s3 + $0x398] sm:$0xff] }
 0x256   : > { %2653 = vmatpush.bf16.msra.mxu2 %v5519_v56  ;;  %2666 = vmatpush.bf16.msra.mxu3 %v5527_v27  ;;  %v5555_v56 = vld [vmem:[%s7257_s3 + $0x3d8] sm:$0xff]  ;;  %v5530_v27 = vld [vmem:[%s7257_s3 + $0x310] sm:$0xff] }
 0x258   : > { %2494 = vmatpush.bf16.msra.mxu0 %v5502_v29  ;;  %2507 = vmatpush.bf16.msra.mxu1 %v5510_v30  ;;  %v5538_v29 = vld [vmem:[%s7257_s3 + $0x350] sm:$0xff] }
 0x259   : > { %v5546_v30 = vld [vmem:[%s7257_s3 + $0x390] sm:$0xff] }
 0x25a   : > { %2654 = vmatpush.bf16.msra.mxu2 %v5518_v31  ;;  %2667 = vmatpush.bf16.msra.mxu3 %v5526_v40  ;;  %v5554_v31 = vld [vmem:[%s7257_s3 + $0x3d0] sm:$0xff]  ;;  %v5529_v40 = vld [vmem:[%s7257_s3 + $0x308] sm:$0xff] }
 0x25c   : > { %2495 = vmatpush.bf16.msra.mxu0 %v5501_v32  ;;  %2508 = vmatpush.bf16.msra.mxu1 %v5509_v41  ;;  %v5537_v32 = vld [vmem:[%s7257_s3 + $0x348] sm:$0xff] }
 0x25d   : > { %v5545_v41 = vld [vmem:[%s7257_s3 + $0x388] sm:$0xff] }
 0x25e   : > { %2655 = vmatpush.bf16.msra.mxu2 %v5517_v38  ;;  %2668 = vmatpush.bf16.msra.mxu3 %v5525_v42  ;;  %v5553_v38 = vld [vmem:[%s7257_s3 + $0x3c8] sm:$0xff]  ;;  %v5528_v42 = vld [vmem:[%s7257_s3 + $0x300] sm:$0xff] }
 0x260   : > { %2496 = vmatpush.bf16.msra.mxu0 %v5500_v39  ;;  %2509 = vmatpush.bf16.msra.mxu1 %v5508_v45  ;;  %v5536_v39 = vld [vmem:[%s7257_s3 + $0x340] sm:$0xff]  ;;  %v5567_v45 = vld [vmem:[%s7257_s3 + $0x438] sm:$0xff] }
 0x262   : > { %2656 = vmatpush.bf16.msra.mxu2 %v5516_v48  ;;  %2669 = vmatpush.bf16.msra.mxu3 %v5524_v59  ;;  %v5575_v48 = vld [vmem:[%s7257_s3 + $0x478] sm:$0xff]  ;;  %v5544_v59 = vld [vmem:[%s7257_s3 + $0x380] sm:$0xff] }
 0x263   : > { %2181 = vmatmul.bf16.vlgmr.msrb.gmra.mxu0 %v2073_v55  ;;  %2194 = vmatmul.bf16.vlgmr.msrb.gmra.mxu1 %v2074_v61  ;;  %v5591_v55 = vld [vmem:[%s7257_s3 + $0x4f8] sm:$0xff]  ;;  %v2713_v61 = vrot.slane %v6778_v23, 3  ;;  %v5582_v23 = vld [vmem:[%s7257_s3 + $0x4b0] sm:$0xff] }
 0x264   : > { %2497 = vmatpush.bf16.msra.mxu0 %v5499_v1  ;;  %2510 = vmatpush.bf16.msra.mxu1 %v5507_v17  ;;  %v5552_v1 = vld [vmem:[%s7257_s3 + $0x3c0] sm:$0xff]  ;;  %v5583_v17 = vld [vmem:[%s7257_s3 + $0x4b8] sm:$0xff] }
 0x265   : > { %2341 = vmatmul.bf16.vlgmr.msrb.gmra.mxu2 %v2233_v18  ;;  %2354 = vmatmul.bf16.vlgmr.msrb.gmra.mxu3 %v2234_v33  ;;  %v5574_v18 = vld [vmem:[%s7257_s3 + $0x470] sm:$0xff]  ;;  %v2873_v33 = vrot.slane %v6791_v58, 3  ;;  %v5565_v58 = vld [vmem:[%s7257_s3 + $0x428] sm:$0xff] }
 0x266   : > { %2657 = vmatpush.bf16.msra.mxu2 %v5515_v49  ;;  %2670 = vmatpush.bf16.msra.mxu3 %v5523_v51  ;;  %v2714_v49 = vrot.slane %v6780_v54, 3  ;;  %v5566_v51 = vld [vmem:[%s7257_s3 + $0x430] sm:$0xff] }
 0x267   : > { %v5590_v54 = vld [vmem:[%s7257_s3 + $0x4f0] sm:$0xff] }
 0x268   : > { %2498 = vmatpush.bf16.msra.mxu0 %v5498_v46  ;;  %2511 = vmatpush.bf16.msra.mxu1 %v5506_v34  ;;  %v2874_v46 = vrot.slane %v6794_v28, 3  ;;  %v5573_v28 = vld [vmem:[%s7257_s3 + $0x468] sm:$0xff] }
 0x269   : > { %v5581_v34 = vld [vmem:[%s7257_s3 + $0x4a8] sm:$0xff] }
 0x26a   : > { %2658 = vmatpush.bf16.msra.mxu2 %v5514_v47  ;;  %2671 = vmatpush.bf16.msra.mxu3 %v5522_v7  ;;  %v5589_v47 = vld [vmem:[%s7257_s3 + $0x4e8] sm:$0xff]  ;;  %v5564_v7 = vld [vmem:[%s7257_s3 + $0x420] sm:$0xff] }
 0x26c   : > { %2499 = vmatpush.bf16.msra.mxu0 %v5497_v15  ;;  %2512 = vmatpush.bf16.msra.mxu1 %v5505_v16  ;;  %v5572_v15 = vld [vmem:[%s7257_s3 + $0x460] sm:$0xff]  ;;  %v1620_v16 = vpop.f32.mrf.mxu0 }
 0x26e   : > { %2659 = vmatpush.bf16.msra.mxu2 %v5513_v2  ;;  %2672 = vmatpush.bf16.msra.mxu3 %v5521_v8  ;;  %v1643_v2 = vpop.f32.mrf.mxu1  ;;  %v5580_v8 = vld [vmem:[%s7257_s3 + $0x4a0] sm:$0xff] }
 0x270   : > { %2500 = vmatpush.bf16.msra.mxu0 %v5496_v57  ;;  %2513 = vmatpush.bf16.msra.mxu1 %v5504_v19  ;;  %v5588_v57 = vld [vmem:[%s7257_s3 + $0x4e0] sm:$0xff]  ;;  %v1672_v19 = vpop.f32.mrf.mxu2 }
 0x272   : > { %2660 = vmatpush.bf16.msra.mxu2 %v5512_v25  ;;  %2673 = vmatpush.bf16.msra.mxu3 %v5520_v53  ;;  %v5571_v25 = vld [vmem:[%s7257_s3 + $0x458] sm:$0xff]  ;;  %v1700_v53 = vmax.f32 %v1620_v16, %v1672_v19 }
 0x273   : > { %2501 = vmatmul.bf16.vlgmr.msra.gmra.mxu0 %v2393_v35  ;;  %2514 = vmatmul.bf16.vlgmr.msra.gmra.mxu1 %v2394_v50  ;;  %v5570_v35 = vld [vmem:[%s7257_s3 + $0x450] sm:$0xff] }
 0x274   : > { %2813 = vmatpush.bf16.msrb.mxu0 %v5535_v9  ;;  %2826 = vmatpush.bf16.msrb.mxu1 %v5543_v11  ;;  %v1695_v9 = vpop.f32.mrf.mxu3  ;;  %v5563_v11 = vld [vmem:[%s7257_s3 + $0x418] sm:$0xff]  ;;  %v1710_v50 = vadd.f32 %v1704_v62, %v1700_v53 }
 0x275   : > { %2661 = vmatmul.bf16.vlgmr.msra.gmra.mxu2 %v2553_v20  ;;  %2674 = vmatmul.bf16.vlgmr.msra.gmra.mxu3 %v2554_v60  ;;  %v5586_v20 = vld [vmem:[%s7257_s3 + $0x4d0] sm:$0xff]  ;;  %v5561_v60 = vld [vmem:[%s7257_s3 + $0x408] sm:$0xff] }
 0x276   : > { %2973 = vmatpush.bf16.msrb.mxu2 %v5551_v12  ;;  %2986 = vmatpush.bf16.msrb.mxu3 %v5559_v43  ;;  %v1701_v12 = vmax.f32 %v1643_v2, %v1695_v9  ;;  %v5579_v43 = vld [vmem:[%s7257_s3 + $0x498] sm:$0xff]  ;;  %v1714_v62 = vmax.f32 %v1710_v50, 0.0 }
 0x278   : > { %2814 = vmatpush.bf16.msrb.mxu0 %v5534_v24  ;;  %2827 = vmatpush.bf16.msrb.mxu1 %v5542_v26  ;;  %v5587_v24 = vld [vmem:[%s7257_s3 + $0x4d8] sm:$0xff]  ;;  %v5562_v26 = vld [vmem:[%s7257_s3 + $0x410] sm:$0xff] }
 0x27a   : > { %2974 = vmatpush.bf16.msrb.mxu2 %v5550_v36  ;;  %2987 = vmatpush.bf16.msrb.mxu3 %v5558_v37  ;;  %v1711_v36 = vadd.f32 %v1705_v5, %v1701_v12  ;;  %v5578_v37 = vld [vmem:[%s7257_s3 + $0x490] sm:$0xff] }
 0x27c   : > { %2815 = vmatpush.bf16.msrb.mxu0 %v5533_v14  ;;  %2828 = vmatpush.bf16.msrb.mxu1 %v5541_v3  ;;  %v1715_v5 = vmax.f32 %v1711_v36, 0.0  ;;  %v5577_v14 = vld [vmem:[%s7257_s3 + $0x488] sm:$0xff] }
 0x27d   : > { %v5585_v3 = vld [vmem:[%s7257_s3 + $0x4c8] sm:$0xff] }
 0x27e   : > { %2975 = vmatpush.bf16.msrb.mxu2 %v5549_v63  ;;  %2988 = vmatpush.bf16.msrb.mxu3 %v5557_v52  ;;  %v5560_v63 = vld [vmem:[%s7257_s3 + $0x400] sm:$0xff] }
 0x27f   : > { %v5568_v52 = vld [vmem:[%s7257_s3 + $0x440] sm:$0xff] }
 0x280   : > { %2816 = vmatpush.bf16.msrb.mxu0 %v5532_v4  ;;  %2829 = vmatpush.bf16.msrb.mxu1 %v5540_v0  ;;  %v7084_v4 = vpack.c.bf16 %v1714_v62, %v1714_v62  ;;  %v7086_v0 = vpack.c.bf16 %v1715_v5, %v1715_v5 }
 0x282   : > { %2976 = vmatpush.bf16.msrb.mxu2 %v5548_v21  ;;  %2989 = vmatpush.bf16.msrb.mxu3 %v5556_v44  ;;  %v5599_v21 = vld [vmem:[%s7257_s3 + $0x538] sm:$0xff]  ;;  %v3357_v16 = vrot.slane %v7084_v4, 1  ;;  %v3358_v2 = vrot.slane %v7086_v0, 1 }
 0x283   : > { %v5607_v44 = vld [vmem:[%s7257_s3 + $0x578] sm:$0xff] }
 0x284   : > { %2817 = vmatpush.bf16.msrb.mxu0 %v5531_v6  ;;  %2830 = vmatpush.bf16.msrb.mxu1 %v5539_v22  ;;  %v5576_v6 = vld [vmem:[%s7257_s3 + $0x480] sm:$0xff] }
 0x285   : > { %v5584_v22 = vld [vmem:[%s7257_s3 + $0x4c0] sm:$0xff] }
 0x286   : > { %2977 = vmatpush.bf16.msrb.mxu2 %v5547_v10  ;;  %2990 = vmatpush.bf16.msrb.mxu3 %v5555_v56  ;;  %v5615_v10 = vld [vmem:[%s7257_s3 + $0x5b8] sm:$0xff] }
 0x287   : > { %v5623_v56 = vld [vmem:[%s7257_s3 + $0x5f8] sm:$0xff] }
 0x288   : > { %2818 = vmatpush.bf16.msrb.mxu0 %v5530_v27  ;;  %2831 = vmatpush.bf16.msrb.mxu1 %v5538_v29  ;;  %v3192_v27 = vshrl.u32 %v7084_v4, 16  ;;  %v3195_v29 = vshrl.u32 %v7086_v0, 16 }
 0x28a   : > { %2978 = vmatpush.bf16.msrb.mxu2 %v5546_v30  ;;  %2991 = vmatpush.bf16.msrb.mxu3 %v5554_v31  ;;  %v5598_v30 = vld [vmem:[%s7257_s3 + $0x530] sm:$0xff] }
 0x28b   : > { %v5606_v31 = vld [vmem:[%s7257_s3 + $0x570] sm:$0xff] }
 0x28c   : > { %2819 = vmatpush.bf16.msrb.mxu0 %v5529_v40  ;;  %2832 = vmatpush.bf16.msrb.mxu1 %v5537_v32  ;;  %v5614_v40 = vld [vmem:[%s7257_s3 + $0x5b0] sm:$0xff] }
 0x28d   : > { %v5622_v32 = vld [vmem:[%s7257_s3 + $0x5f0] sm:$0xff] }
 0x28e   : > { %2979 = vmatpush.bf16.msrb.mxu2 %v5545_v41  ;;  %2992 = vmatpush.bf16.msrb.mxu3 %v5553_v38  ;;  %v5597_v41 = vld [vmem:[%s7257_s3 + $0x528] sm:$0xff] }
 0x28f   : > { %v5605_v38 = vld [vmem:[%s7257_s3 + $0x568] sm:$0xff] }
 0x290   : > { %2820 = vmatpush.bf16.msrb.mxu0 %v5528_v42  ;;  %2833 = vmatpush.bf16.msrb.mxu1 %v5536_v39  ;;  %v5613_v42 = vld [vmem:[%s7257_s3 + $0x5a8] sm:$0xff] }
 0x291   : > { %v5621_v39 = vld [vmem:[%s7257_s3 + $0x5e8] sm:$0xff] }
 0x292   : > { %2980 = vmatpush.bf16.msrb.mxu2 %v5544_v59  ;;  %2993 = vmatpush.bf16.msrb.mxu3 %v5552_v1  ;;  %v5612_v59 = vld [vmem:[%s7257_s3 + $0x5a0] sm:$0xff] }
 0x293   : > { %2821 = vmatmul.bf16.vlgmr.msrb.gmra.mxu0 %v2713_v61  ;;  %2834 = vmatmul.bf16.vlgmr.msrb.gmra.mxu1 %v2714_v49  ;;  %v5620_v1 = vld [vmem:[%s7257_s3 + $0x5e0] sm:$0xff]  ;;  %v5611_v61 = vld [vmem:[%s7257_s3 + $0x598] sm:$0xff] }
 0x294   : > { %3131 = vmatpush.bf16.msra.mxu0 %v5567_v45  ;;  %3144 = vmatpush.bf16.msra.mxu1 %v5575_v48  ;;  %v5596_v45 = vld [vmem:[%s7257_s3 + $0x520] sm:$0xff]  ;;  %v5619_v49 = vld [vmem:[%s7257_s3 + $0x5d8] sm:$0xff] }
 0x295   : > { %2981 = vmatmul.bf16.vlgmr.msrb.gmra.mxu2 %v2873_v33  ;;  %2994 = vmatmul.bf16.vlgmr.msrb.gmra.mxu3 %v2874_v46  ;;  %v5604_v48 = vld [vmem:[%s7257_s3 + $0x560] sm:$0xff]  ;;  %v5610_v33 = vld [vmem:[%s7257_s3 + $0x590] sm:$0xff] }
 0x296   : > { %3295 = vmatpush.bf16.msra.mxu2 %v5583_v17  ;;  %3308 = vmatpush.bf16.msra.mxu3 %v5591_v55  ;;  %v5595_v17 = vld [vmem:[%s7257_s3 + $0x518] sm:$0xff]  ;;  %v5618_v46 = vld [vmem:[%s7257_s3 + $0x5d0] sm:$0xff] }
 0x297   : > { %v5603_v55 = vld [vmem:[%s7257_s3 + $0x558] sm:$0xff] }
 0x298   : > { %3132 = vmatpush.bf16.msra.mxu0 %v5566_v51  ;;  %3145 = vmatpush.bf16.msra.mxu1 %v5574_v18  ;;  %v5594_v51 = vld [vmem:[%s7257_s3 + $0x510] sm:$0xff] }
 0x299   : > { %v5602_v18 = vld [vmem:[%s7257_s3 + $0x550] sm:$0xff] }
 0x29a   : > { %3296 = vmatpush.bf16.msra.mxu2 %v5582_v23  ;;  %3309 = vmatpush.bf16.msra.mxu3 %v5590_v54  ;;  %v5593_v23 = vld [vmem:[%s7257_s3 + $0x508] sm:$0xff] }
 0x29b   : > { %v5601_v54 = vld [vmem:[%s7257_s3 + $0x548] sm:$0xff] }
 0x29c   : > { %3133 = vmatpush.bf16.msra.mxu0 %v5565_v58  ;;  %3146 = vmatpush.bf16.msra.mxu1 %v5573_v28  ;;  %v5609_v58 = vld [vmem:[%s7257_s3 + $0x588] sm:$0xff] }
 0x29d   : > { %v5617_v28 = vld [vmem:[%s7257_s3 + $0x5c8] sm:$0xff] }
 0x29e   : > { %3297 = vmatpush.bf16.msra.mxu2 %v5581_v34  ;;  %3310 = vmatpush.bf16.msra.mxu3 %v5589_v47  ;;  %v5592_v34 = vld [vmem:[%s7257_s3 + $0x500] sm:$0xff] }
 0x29f   : > { %v5600_v47 = vld [vmem:[%s7257_s3 + $0x540] sm:$0xff] }
 0x2a0   : > { %3134 = vmatpush.bf16.msra.mxu0 %v5564_v7  ;;  %3147 = vmatpush.bf16.msra.mxu1 %v5572_v15  ;;  %v5608_v7 = vld [vmem:[%s7257_s3 + $0x580] sm:$0xff] }
 0x2a1   : > { %v5616_v15 = vld [vmem:[%s7257_s3 + $0x5c0] sm:$0xff] }
 0x2a2   : > { %3298 = vmatpush.bf16.msra.mxu2 %v5580_v8  ;;  %3311 = vmatpush.bf16.msra.mxu3 %v5588_v57  ;;  %v3517_v8 = vrot.slane %v3192_v27, 1  ;;  %v3518_v57 = vrot.slane %v3195_v29, 1 }
 0x2a4   : > { %3135 = vmatpush.bf16.msra.mxu0 %v5563_v11  ;;  %3148 = vmatpush.bf16.msra.mxu1 %v5571_v25  ;;  %v1716_v25 = vld [vmem:[%s7258_s4] sm:$0x1] }
 0x2a6   : > { %3299 = vmatpush.bf16.msra.mxu2 %v5579_v43  ;;  %3312 = vmatpush.bf16.msra.mxu3 %v5587_v24 }
 0x2a8   : > { %3136 = vmatpush.bf16.msra.mxu0 %v5562_v26  ;;  %3149 = vmatpush.bf16.msra.mxu1 %v5570_v35 }
 0x2aa   : > { %3300 = vmatpush.bf16.msra.mxu2 %v5578_v37  ;;  %3313 = vmatpush.bf16.msra.mxu3 %v5586_v20 }
 0x2ac   : > { %3137 = vmatpush.bf16.msra.mxu0 %v5561_v60  ;;  %3150 = vmatpush.bf16.msra.mxu1 %v5569_v13 }
 0x2ae   : > { %3301 = vmatpush.bf16.msra.mxu2 %v5577_v14  ;;  %3314 = vmatpush.bf16.msra.mxu3 %v5585_v3 }
 0x2b0   : > { %3138 = vmatpush.bf16.msra.mxu0 %v5560_v63  ;;  %3151 = vmatpush.bf16.msra.mxu1 %v5568_v52 }
 0x2b2   : > { %3302 = vmatpush.bf16.msra.mxu2 %v5576_v6  ;;  %3315 = vmatpush.bf16.msra.mxu3 %v5584_v22 }
 0x2b3   : > { %3139 = vmatmul.bf16.vlgmr.msra.gmra.mxu0 %v7084_v4  ;;  %3152 = vmatmul.bf16.vlgmr.msra.gmra.mxu1 %v7086_v0 }
 0x2b4   : > { %3457 = vmatpush.bf16.msrb.mxu0 %v5599_v21  ;;  %3470 = vmatpush.bf16.msrb.mxu1 %v5607_v44 }
 0x2b5   : > { %3303 = vmatmul.bf16.vlgmr.msra.gmra.mxu2 %v3192_v27  ;;  %3316 = vmatmul.bf16.vlgmr.msra.gmra.mxu3 %v3195_v29 }
 0x2b6   : > { %3617 = vmatpush.bf16.msrb.mxu2 %v5615_v10  ;;  %3630 = vmatpush.bf16.msrb.mxu3 %v5623_v56 }
 0x2b8   : > { %3458 = vmatpush.bf16.msrb.mxu0 %v5598_v30  ;;  %3471 = vmatpush.bf16.msrb.mxu1 %v5606_v31 }
 0x2ba   : > { %3618 = vmatpush.bf16.msrb.mxu2 %v5614_v40  ;;  %3631 = vmatpush.bf16.msrb.mxu3 %v5622_v32 }
 0x2bc   : > { %3459 = vmatpush.bf16.msrb.mxu0 %v5597_v41  ;;  %3472 = vmatpush.bf16.msrb.mxu1 %v5605_v38 }
 0x2be   : > { %3619 = vmatpush.bf16.msrb.mxu2 %v5613_v42  ;;  %3632 = vmatpush.bf16.msrb.mxu3 %v5621_v39 }
 0x2c0   : > { %3460 = vmatpush.bf16.msrb.mxu0 %v5596_v45  ;;  %3473 = vmatpush.bf16.msrb.mxu1 %v5604_v48 }
 0x2c2   : > { %3620 = vmatpush.bf16.msrb.mxu2 %v5612_v59  ;;  %3633 = vmatpush.bf16.msrb.mxu3 %v5620_v1 }
 0x2c4   : > { %3461 = vmatpush.bf16.msrb.mxu0 %v5595_v17  ;;  %3474 = vmatpush.bf16.msrb.mxu1 %v5603_v55  ;;  %v5627_v55 = vld [vmem:[%s7259_s5 + $0x18] sm:$0xff] }
 0x2c6   : > { %3621 = vmatpush.bf16.msrb.mxu2 %v5611_v61  ;;  %3634 = vmatpush.bf16.msrb.mxu3 %v5619_v49 }
 0x2c8   : > { %3462 = vmatpush.bf16.msrb.mxu0 %v5594_v51  ;;  %3475 = vmatpush.bf16.msrb.mxu1 %v5602_v18  ;;  %v5626_v51 = vld [vmem:[%s7259_s5 + $0x10] sm:$0xff]  ;;  %v5625_v18 = vld [vmem:[%s7259_s5 + $0x8] sm:$0xff] }
 0x2ca   : > { %3622 = vmatpush.bf16.msrb.mxu2 %v5610_v33  ;;  %3635 = vmatpush.bf16.msrb.mxu3 %v5618_v46 }
 0x2cc   : > { %3463 = vmatpush.bf16.msrb.mxu0 %v5593_v23  ;;  %3476 = vmatpush.bf16.msrb.mxu1 %v5601_v54 }
 0x2ce   : > { %3623 = vmatpush.bf16.msrb.mxu2 %v5609_v58  ;;  %3636 = vmatpush.bf16.msrb.mxu3 %v5617_v28  ;;  %v5624_v58 = vld [vmem:[%s7259_s5] sm:$0xff] }
 0x2d0   : > { %3464 = vmatpush.bf16.msrb.mxu0 %v5592_v34  ;;  %3477 = vmatpush.bf16.msrb.mxu1 %v5600_v47  ;;  %v1856_v19 = vpop.f32.mrf.mxu0  ;;  %v1869_v9 = vpop.f32.mrf.mxu1 }
 0x2d1   : > { %v1870_v11 = vadd.f32 %v1869_v9, %v1856_v19 }
 0x2d2   : > { %3624 = vmatpush.bf16.msrb.mxu2 %v5608_v7  ;;  %3637 = vmatpush.bf16.msrb.mxu3 %v5616_v15 }
 0x2d3   : > { %3465 = vmatmul.bf16.vlgmr.msrb.gmra.mxu0 %v3357_v16  ;;  %3478 = vmatmul.bf16.vlgmr.msrb.gmra.mxu1 %v3358_v2  ;;  %v1873_v26 = vadd.f32 %v1870_v11, %v1716_v25 }
 0x2d4   : > { %3687 = vmatpush.bf16.msra.mxu0 %v5627_v55 }
 0x2d5   : > { %3625 = vmatmul.bf16.vlgmr.msrb.gmra.mxu2 %v3517_v8  ;;  %3638 = vmatmul.bf16.vlgmr.msrb.gmra.mxu3 %v3518_v57 }
 0x2d8   : > { %v1858_v53 = vpop.f32.mrf.mxu0  ;;  %v1871_v12 = vpop.f32.mrf.mxu1  ;;  %3688 = vmatpush.bf16.msra.mxu0 %v5626_v51 }
 0x2d9   : > { %v2020_v43 = vpop.f32.mrf.mxu2  ;;  %v2033_v24 = vpop.f32.mrf.mxu3 }
 0x2da   : > { %v2034_v35 = vadd.f32 %v2033_v24, %v2020_v43 }
 0x2dc   : > { %v2037_v50 = vadd.f32 %v2034_v35, %v1873_v26  ;;  %3689 = vmatpush.bf16.msra.mxu0 %v5625_v18 }
 0x2e0   : > { %v2182_v36 = vpop.f32.mrf.mxu0  ;;  %v2195_v37 = vpop.f32.mrf.mxu1  ;;  %3690 = vmatpush.bf16.msra.mxu0 %v5624_v58 }
 0x2e1   : > { %v2022_v20 = vpop.f32.mrf.mxu2  ;;  %v2035_v60 = vpop.f32.mrf.mxu3  ;;  %v2196_v13 = vadd.f32 %v2195_v37, %v2182_v36 }
 0x2e3   : > { %v2199_v62 = vadd.f32 %v2196_v13, %v2037_v50  ;;  %v3654_v13 = vld [vmem:[%s7260_s6] sm:$0x1] }
 0x2e8   : > { %v2184_v5 = vpop.f32.mrf.mxu0  ;;  %v2197_v14 = vpop.f32.mrf.mxu1 }
 0x2e9   : > { %v2342_v3 = vpop.f32.mrf.mxu2  ;;  %v2355_v63 = vpop.f32.mrf.mxu3 }
 0x2ea   : > { %v2356_v52 = vadd.f32 %v2355_v63, %v2342_v3 }
 0x2ec   : > { %v2359_v4 = vadd.f32 %v2356_v52, %v2199_v62 }
 0x2f0   : > { %v2502_v44 = vpop.f32.mrf.mxu0  ;;  %v2515_v6 = vpop.f32.mrf.mxu1 }
 0x2f1   : > { %v2344_v0 = vpop.f32.mrf.mxu2  ;;  %v2357_v21 = vpop.f32.mrf.mxu3  ;;  %v2516_v22 = vadd.f32 %v2515_v6, %v2502_v44 }
 0x2f3   : > { %v2519_v10 = vadd.f32 %v2516_v22, %v2359_v4 }
 0x2f8   : > { %v2504_v29 = vpop.f32.mrf.mxu0  ;;  %v2517_v30 = vpop.f32.mrf.mxu1 }
 0x2f9   : > { %v2662_v56 = vpop.f32.mrf.mxu2  ;;  %v2675_v27 = vpop.f32.mrf.mxu3 }
 0x2fa   : > { %v2676_v31 = vadd.f32 %v2675_v27, %v2662_v56 }
 0x2fc   : > { %v2679_v40 = vadd.f32 %v2676_v31, %v2519_v10 }
 0x301   : > { %v2664_v32 = vpop.f32.mrf.mxu2  ;;  %v2677_v41 = vpop.f32.mrf.mxu3 }
 0x310   : > { %v2822_v38 = vpop.f32.mrf.mxu0  ;;  %v2835_v42 = vpop.f32.mrf.mxu1 }
 0x311   : > { %v2836_v47 = vadd.f32 %v2835_v42, %v2822_v38 }
 0x313   : > { %v2839_v2 = vadd.f32 %v2836_v47, %v2679_v40 }
 0x318   : > { %v2824_v39 = vpop.f32.mrf.mxu0  ;;  %v2837_v45 = vpop.f32.mrf.mxu1 }
 0x319   : > { %v2982_v48 = vpop.f32.mrf.mxu2  ;;  %v2995_v59 = vpop.f32.mrf.mxu3 }
 0x31a   : > { %v2996_v7 = vadd.f32 %v2995_v59, %v2982_v48 }
 0x31c   : > { %v2999_v57 = vadd.f32 %v2996_v7, %v2839_v2 }
 0x321   : > { %v2984_v1 = vpop.f32.mrf.mxu2  ;;  %v2997_v17 = vpop.f32.mrf.mxu3 }
 0x330   : > { %v3140_v61 = vpop.f32.mrf.mxu0  ;;  %v3153_v49 = vpop.f32.mrf.mxu1 }
 0x331   : > { %v3154_v8 = vadd.f32 %v3153_v49, %v3140_v61 }
 0x333   : > { %v3157_v9 = vadd.f32 %v3154_v8, %v2999_v57 }
 0x338   : > { %v3304_v33 = vpop.f32.mrf.mxu2  ;;  %v3317_v46 = vpop.f32.mrf.mxu3 }
 0x339   : > { %v3142_v23 = vpop.f32.mrf.mxu0  ;;  %v3155_v54 = vpop.f32.mrf.mxu1  ;;  %v3318_v19 = vadd.f32 %v3317_v46, %v3304_v33 }
 0x33b   : > { %v3321_v25 = vadd.f32 %v3318_v19, %v3157_v9 }
 0x340   : > { %v3306_v28 = vpop.f32.mrf.mxu2  ;;  %v3319_v34 = vpop.f32.mrf.mxu3 }
 0x350   : > { %v3466_v15 = vpop.f32.mrf.mxu0  ;;  %v3479_v16 = vpop.f32.mrf.mxu1 }
 0x351   : > { %v3480_v11 = vadd.f32 %v3479_v16, %v3466_v15 }
 0x353   : > { %v3483_v26 = vadd.f32 %v3480_v11, %v3321_v25 }
 0x358   : > { %v3468_v53 = vpop.f32.mrf.mxu0  ;;  %v3481_v12 = vpop.f32.mrf.mxu1 }
 0x359   : > { %v3626_v43 = vpop.f32.mrf.mxu2  ;;  %v3639_v24 = vpop.f32.mrf.mxu3 }
 0x35a   : > { %v3640_v35 = vadd.f32 %v3639_v24, %v3626_v43 }
 0x35c   : > { %v3643_v50 = vadd.f32 %v3640_v35, %v3483_v26 }
 0x35e   : > { %v3644_v36 = vmax.f32 %v3643_v50, 0.0 }
 0x360   : > { %v3645_v37 = vpack.c.bf16 %v3644_v36, %v3644_v36 }
 0x361   : > { %v3628_v20 = vpop.f32.mrf.mxu2  ;;  %v3641_v60 = vpop.f32.mrf.mxu3 }
 0x362   : > { %5356 = vmatmul.msk.bf16.vlgmr.msra.gmra.mxu0 %vm3679_vm13, %v3645_v37 }
 0x3df   : > { %v3692_v62 = vpop.f32.mrf.mxu0 }
 0x3e0   : > { %v3693_v5 = vadd.f32 %v3692_v62, %v3654_v13 }
 0x3e2   : > { %v3697_v14 = vsel %vm3696_vm14, %v3693_v5, -inf }
 0x3e3   : > { %3698 = vmax.xlane.f32.xlu0 %v3697_v14 }
 0x3e7   : > { %v3694_v3 = vpop.f32.mrf.mxu0 }
 0x456   : > { %v3699_v63 = vpop.xlane.xlu0 %3698 }
 0x457   : > { %v3700_v52 = vsub.f32 %v3693_v5, %v3699_v63 }
 0x459   : > { %v3701_v4 = vmul.f32 1.442695, %v3700_v52 }
 0x45b   : > { %5668 = vpow2.f32 %v3701_v4 }
 0x461   : > { %v5669_v0 = vpop.eup %5668 }
 0x462   : > { %v3703_v21 = vsel %vm3696_vm14, %v5669_v0, 0.0 }
 0x463   : > { %3704 = vadd.xlane.f32.xlu0 %v3703_v21 }
 0x4d6   : > { %v3705_v44 = vpop.xlane.xlu0 %3704 }
 0x4d7   : > { %5670 = vlog2.f32 %v3705_v44 }
 0x4dd   : > { %v5671_v6 = vpop.eup %5670 }
 0x4de   : > { %v3707_v22 = vmul.f32 0.6931472, %v5671_v6 }
 0x4e0   : > { %v3708_v10 = vsub.f32 %v3700_v52, %v3707_v22 }
 0x4e2   : > { %3709 = vst [vmem:[%s270_s22] sm:$0x1] %v3708_v10 }
 0x4e3   : > { %5699 = shalt.err (!%p5696_p3)
}
 0x4e4   : > { %5628 = dma.vmem_to_hbm [thread:$0]  (%p5815_p5), %s3722_s29, 16, %s3724_s8, %s3711_s9  }
 0x4e5 PF: > { %p5634_p4 = scmp.ge.s32.totalorder %s5734_s27, 2  ;;  %s3735_s18 = sand.u32 1, %s5722_s24  }
 0x4e6   : > { %s3736_s19 = scalar_lea.sflag [#allocation3], %s3735_s18 }
 0x4e7   : > { %p5631_p7 = pnand %p5634_p4, %p5819_p6 }
 0x4e9   : > { %p5632_p8 = pneg %p5631_p7 }
 0x4eb   : > { %5717 = dma.done.wait (%p5632_p8), %s3736_s19, 16  }
 0x4ec   : > { %5719 = vsyncadd (%p5632_p8), %s3736_s19, 4294967280  ;;  %p17_p9 = scmp.ge.s32.totalorder %s5802_s30, 4   ;;  %s7264_s24 = smov %s5726_s25 }
 0x4ed   : > { %s7265_s25 = smov %s5730_s26  ;;  %s7266_s26 = smov %s5813_s10 }
 0x4ee   : > { %s7267_s27 = smov %s5802_s30  ;;  %19 = sbr.rel (!%p17_p9) target bundleno = 3 (0x3), region = 102 }
 0x4f3   :  { %3741 = vsyncpa [#allocation3], 1 }
 0x4f4   :  { %3743 = vsyncpa [#allocation3 + $0x1], 1 }

</bundles_post_ra>
